<compile_context>
chip_gen: v7x
topology: tpu7x:2x2x1
jax: 0.10.0
libtpu: 0.0.40
codegen_flags: <defaults>
</compile_context>

<pallas_src>
import jax
import jax.numpy as jnp
import numpy as np
from jax.experimental import pallas as pl
from jax.experimental.pallas import tpu as pltpu

# ----- model hyper-parameters (small, consistent with the module) -----------
EMBED_DIM = 32
NHEAD = 4
NUM_LAYERS = 2
MAX_SENSORS = 8
BATCH = 2

HEAD_DIM = EMBED_DIM // NHEAD
FFN_DIM = 2 * EMBED_DIM
LN_EPS = 1e-5
NEG_INF = -1e30  # additive mask value for padded / cross-batch keys
# TODO(synk): a fully-padded sensor row yields a finite (uniform-attention)
# output here, whereas PyTorch would produce NaN for that row.


# ----- in-kernel helpers -----------------------------------------------------
def _layer_norm(x, w, b):
    # x: (N, E), w/b: (1, E)
    mu = jnp.mean(x, axis=-1, keepdims=True)
    var = jnp.mean((x - mu) ** 2, axis=-1, keepdims=True)
    return (x - mu) * jax.lax.rsqrt(var + LN_EPS) * w + b


def transformer_kernel(bias_ref, x_ref, pos_ref,
                       inw_ref, inb_ref, outw_ref, outb_ref,
                       l1w_ref, l1b_ref, l2w_ref, l2b_ref,
                       n1w_ref, n1b_ref, n2w_ref, n2b_ref,
                       fnw_ref, fnb_ref, o_ref):
    N, E = x_ref.shape            # N = B * S (batch folded into rows)
    S = pos_ref.shape[0]
    B = N // S
    L = inw_ref.shape[0]
    H = NHEAD
    D = HEAD_DIM
    scale = 1.0 / float(np.sqrt(D))

    # x + pos_encoder (pos tiled over the folded batch rows) -- hoisted.
    x = x_ref[...] + jnp.concatenate([pos_ref[...]] * B, axis=0)            # (N, E)

    # Additive attention bias (key padding + block-diagonal batch mask),
    # pre-broadcast to all heads once so per-layer adds are same-shape VPU adds.
    bias = jnp.broadcast_to(bias_ref[...].reshape(1, N, N), (H, N, N))      # (H, N, N)

    for l in range(L):
        # ------------- pre-LN multi-head self-attention ----------------------
        h_ln = _layer_norm(x, n1w_ref[pl.ds(l, 1), :], n1b_ref[pl.ds(l, 1), :])
        qkv = (jnp.dot(h_ln, inw_ref[l], preferred_element_type=jnp.float32)
               + inb_ref[pl.ds(l, 1), :])                                   # (N, 3E)

        # Head-stacked views (H, N, D); 1/sqrt(D) folded into q.
        qh = jnp.stack([qkv[:, h * D:(h + 1) * D]
                        for h in range(H)], axis=0) * scale
        kh = jnp.stack([qkv[:, E + h * D:E + (h + 1) * D]
                        for h in range(H)], axis=0)
        vh = jnp.stack([qkv[:, 2 * E + h * D:2 * E + (h + 1) * D]
                        for h in range(H)], axis=0)

        s = jnp.einsum("hqd,hkd->hqk", qh, kh,
                       preferred_element_type=jnp.float32)                  # (H, N, N)
        s = s + bias
        s = s - jnp.max(s, axis=-1, keepdims=True)
        p = jnp.exp(s)
        p = p / jnp.sum(p, axis=-1, keepdims=True)
        ctx = jnp.einsum("hqk,hkd->hqd", p, vh,
                         preferred_element_type=jnp.float32)                # (H, N, D)
        ctx = jnp.concatenate([ctx[h] for h in range(H)], axis=-1)          # (N, E)

        attn_out = (jnp.dot(ctx, outw_ref[l], preferred_element_type=jnp.float32)
                    + outb_ref[pl.ds(l, 1), :])
        x = x + attn_out

        # ------------- pre-LN feed-forward (ReLU, width 2E) ------------------
        h2 = _layer_norm(x, n2w_ref[pl.ds(l, 1), :], n2b_ref[pl.ds(l, 1), :])
        f = (jnp.dot(h2, l1w_ref[l], preferred_element_type=jnp.float32)
             + l1b_ref[pl.ds(l, 1), :])
        f = jnp.maximum(f, 0.0)
        f = (jnp.dot(f, l2w_ref[l], preferred_element_type=jnp.float32)
             + l2b_ref[pl.ds(l, 1), :])
        x = x + f

    # ------------- final output LayerNorm ------------------------------------
    o_ref[...] = _layer_norm(x, fnw_ref[...], fnb_ref[...])


# ----- wrapper ----------------------------------------------------------------
def inter_sensor_transformer(x, src_key_padding_mask, params):
    B, S, E = x.shape
    N = B * S

    # --- wrapper-side layout plumbing (removes all in-kernel `.T`) -----------
    inw_t = jnp.transpose(params["inw"], (0, 2, 1))    # (L, E, 3E)
    outw_t = jnp.transpose(params["outw"], (0, 2, 1))  # (L, E, E)
    l1w_t = jnp.transpose(params["l1w"], (0, 2, 1))    # (L, E, 2E)
    l2w_t = jnp.transpose(params["l2w"], (0, 2, 1))    # (L, 2E, E)
    pos = params["pos"][0, :S, :]                      # (S, E)

    # Additive bias: NEG_INF where the key is padded or belongs to another
    # batch element (block-diagonal mask emulates per-batch attention after
    # folding the batch into rows).  Built once, loop-invariant in the kernel.
    pad = src_key_padding_mask.reshape(N)
    bids = jnp.repeat(jnp.arange(B), S)
    allowed = (bids[:, None] == bids[None, :]) & jnp.logical_not(pad)[None, :]
    bias = jnp.where(allowed, 0.0, NEG_INF).astype(jnp.float32)             # (N, N)

    x_flat = x.reshape(N, E).astype(jnp.float32)

    inputs = [bias, x_flat, pos,
              inw_t, params["inb"], outw_t, params["outb"],
              l1w_t, params["l1b"], l2w_t, params["l2b"],
              params["n1w"], params["n1b"], params["n2w"], params["n2b"],
              params["fnw"], params["fnb"]]

    def full_spec(a):
        nd = a.ndim
        return pl.BlockSpec(a.shape, lambda i, _nd=nd: (0,) * _nd)

    in_specs = [full_spec(a) for a in inputs]
    out_spec = pl.BlockSpec((N, E), lambda i: (0, 0))

    # Advisory cost estimate so XLA schedules this micro-kernel sensibly.
    flops_layer = (2 * N * E * 3 * E            # qkv projection
                   + 4 * NHEAD * N * N * HEAD_DIM  # scores + context
                   + 2 * N * E * E              # out projection
                   + 4 * N * E * FFN_DIM)       # FFN
    flops = NUM_LAYERS * flops_layer
    transcendentals = NUM_LAYERS * NHEAD * N * N + (2 * NUM_LAYERS + 1) * N
    bytes_accessed = int(sum(int(np.prod(a.shape)) for a in inputs) * 4 + N * E * 4)

    out = pl.pallas_call(
        transformer_kernel,
        out_shape=jax.ShapeDtypeStruct((N, E), jnp.float32),
        grid=(1,),
        in_specs=in_specs,
        out_specs=out_spec,
        compiler_params=pltpu.CompilerParams(dimension_semantics=("arbitrary",)),
        cost_estimate=pl.CostEstimate(flops=flops,
                                      transcendentals=transcendentals,
                                      bytes_accessed=bytes_accessed),
    )(*inputs)
    return out.reshape(B, S, E)


# ----- deterministic parameter init (shapes from the module __init__) ---------
def init_params(key):
    ks = jax.random.split(key, 8)

    def w(k, shape, scale=0.05):
        return jax.random.normal(k, shape, jnp.float32) * scale

    return {
        "pos": w(ks[0], (1, MAX_SENSORS, EMBED_DIM), 0.02),   # pos_encoder_inter_sensor
        "inw": w(ks[1], (NUM_LAYERS, 3 * EMBED_DIM, EMBED_DIM)),   # attn in_proj_weight
        "inb": jnp.zeros((NUM_LAYERS, 3 * EMBED_DIM), jnp.float32),
        "outw": w(ks[2], (NUM_LAYERS, EMBED_DIM, EMBED_DIM)),      # attn out_proj
        "outb": jnp.zeros((NUM_LAYERS, EMBED_DIM), jnp.float32),
        "l1w": w(ks[3], (NUM_LAYERS, FFN_DIM, EMBED_DIM)),         # linear1
        "l1b": w(ks[4], (NUM_LAYERS, FFN_DIM), 0.01),
        "l2w": w(ks[5], (NUM_LAYERS, EMBED_DIM, FFN_DIM)),         # linear2
        "l2b": w(ks[6], (NUM_LAYERS, EMBED_DIM), 0.01),
        "n1w": jnp.ones((NUM_LAYERS, EMBED_DIM), jnp.float32),     # norm1
        "n1b": jnp.zeros((NUM_LAYERS, EMBED_DIM), jnp.float32),
        "n2w": jnp.ones((NUM_LAYERS, EMBED_DIM), jnp.float32),     # norm2
        "n2b": jnp.zeros((NUM_LAYERS, EMBED_DIM), jnp.float32),
        "fnw": jnp.ones((1, EMBED_DIM), jnp.float32),              # output_norm
        "fnb": jnp.zeros((1, EMBED_DIM), jnp.float32),
    }


# ----- pure-JAX reference (same math, per-batch) for validation ----------------
def reference_forward(x, src_key_padding_mask, params):
    def ln(t, w, b):
        mu = t.mean(-1, keepdims=True)
        var = ((t - mu) ** 2).mean(-1, keepdims=True)
        return (t - mu) / jnp.sqrt(var + LN_EPS) * w + b

    def one(xb, mb):
        S = xb.shape[0]
        xb = xb + params["pos"][0, :S, :]
        neg = mb.astype(jnp.float32) * NEG_INF
        for l in range(NUM_LAYERS):
            h = ln(xb, params["n1w"][l], params["n1b"][l])
            qkv = h @ params["inw"][l].T + params["inb"][l]
            q, k, v = jnp.split(qkv, 3, axis=-1)
            qh = q.reshape(S, NHEAD, HEAD_DIM).transpose(1, 0, 2)
            kh = k.reshape(S, NHEAD, HEAD_DIM).transpose(1, 0, 2)
            vh = v.reshape(S, NHEAD, HEAD_DIM).transpose(1, 0, 2)
            s = jnp.einsum("hqd,hkd->hqk", qh, kh) / np.sqrt(HEAD_DIM)
            s = s + neg[None, None, :]
            p = jax.nn.softmax(s, axis=-1)
            ctx = jnp.einsum("hqk,hkd->hqd", p, vh).transpose(1, 0, 2).reshape(S, EMBED_DIM)
            xb = xb + ctx @ params["outw"][l].T + params["outb"][l]
            h2 = ln(xb, params["n2w"][l], params["n2b"][l])
            f = jax.nn.relu(h2 @ params["l1w"][l].T + params["l1b"][l])
            f = f @ params["l2w"][l].T + params["l2b"][l]
            xb = xb + f
        return ln(xb, params["fnw"][0], params["fnb"][0])

    return jax.vmap(one)(x, src_key_padding_mask)


if __name__ == "__main__":
    key = jax.random.PRNGKey(0)
    kx, kp = jax.random.split(key)
    params = init_params(kp)

    x = jax.random.normal(kx, (BATCH, MAX_SENSORS, EMBED_DIM), jnp.float32)
    # True = padded sensor (ignored by attention), like PyTorch src_key_padding_mask
    src_key_padding_mask = jnp.array(
        [[False] * 6 + [True] * 2,
         [False] * 8], dtype=bool)

    out = inter_sensor_transformer(x, src_key_padding_mask, params)
    out = jax.block_until_ready(out)

    ref = reference_forward(x, src_key_padding_mask, params)
    np.testing.assert_allclose(np.asarray(out), np.asarray(ref), rtol=2e-4, atol=2e-4)

    print("KERNEL_OK")
</pallas_src>

<mosaic_0001>
module attributes {stable_mosaic.version = 11 : i64} {
  func.func @transformer_kernel(%arg0: i32, %arg1: memref<16x16xf32, #tpu.memory_space<vmem>>, %arg2: memref<16x32xf32, #tpu.memory_space<vmem>>, %arg3: memref<8x32xf32, #tpu.memory_space<vmem>>, %arg4: memref<2x32x96xf32, #tpu.memory_space<vmem>>, %arg5: memref<2x96xf32, #tpu.memory_space<vmem>>, %arg6: memref<2x32x32xf32, #tpu.memory_space<vmem>>, %arg7: memref<2x32xf32, #tpu.memory_space<vmem>>, %arg8: memref<2x32x64xf32, #tpu.memory_space<vmem>>, %arg9: memref<2x64xf32, #tpu.memory_space<vmem>>, %arg10: memref<2x64x32xf32, #tpu.memory_space<vmem>>, %arg11: memref<2x32xf32, #tpu.memory_space<vmem>>, %arg12: memref<2x32xf32, #tpu.memory_space<vmem>>, %arg13: memref<2x32xf32, #tpu.memory_space<vmem>>, %arg14: memref<2x32xf32, #tpu.memory_space<vmem>>, %arg15: memref<2x32xf32, #tpu.memory_space<vmem>>, %arg16: memref<1x32xf32, #tpu.memory_space<vmem>>, %arg17: memref<1x32xf32, #tpu.memory_space<vmem>>, %arg18: memref<16x32xf32, #tpu.memory_space<vmem>>) attributes {dimension_semantics = [#tpu.dimension_semantics<arbitrary>], iteration_bounds = array<i64: 1>, scalar_prefetch = 0 : i64, scratch_operands = 0 : i64, tpu.core_type = #tpu.core_type<tc>, window_params = [{pipeline_mode = #tpu.pipeline_mode<synchronous>, transform_indices = @transform_0, window_bounds = array<i64: 16, 16>}, {pipeline_mode = #tpu.pipeline_mode<synchronous>, transform_indices = @transform_1, window_bounds = array<i64: 16, 32>}, {pipeline_mode = #tpu.pipeline_mode<synchronous>, transform_indices = @transform_2, window_bounds = array<i64: 8, 32>}, {pipeline_mode = #tpu.pipeline_mode<synchronous>, transform_indices = @transform_3, window_bounds = array<i64: 2, 32, 96>}, {pipeline_mode = #tpu.pipeline_mode<synchronous>, transform_indices = @transform_4, window_bounds = array<i64: 2, 96>}, {pipeline_mode = #tpu.pipeline_mode<synchronous>, transform_indices = @transform_5, window_bounds = array<i64: 2, 32, 32>}, {pipeline_mode = #tpu.pipeline_mode<synchronous>, transform_indices = @transform_6, window_bounds = array<i64: 2, 32>}, {pipeline_mode = #tpu.pipeline_mode<synchronous>, transform_indices = @transform_7, window_bounds = array<i64: 2, 32, 64>}, {pipeline_mode = #tpu.pipeline_mode<synchronous>, transform_indices = @transform_8, window_bounds = array<i64: 2, 64>}, {pipeline_mode = #tpu.pipeline_mode<synchronous>, transform_indices = @transform_9, window_bounds = array<i64: 2, 64, 32>}, {pipeline_mode = #tpu.pipeline_mode<synchronous>, transform_indices = @transform_10, window_bounds = array<i64: 2, 32>}, {pipeline_mode = #tpu.pipeline_mode<synchronous>, transform_indices = @transform_11, window_bounds = array<i64: 2, 32>}, {pipeline_mode = #tpu.pipeline_mode<synchronous>, transform_indices = @transform_12, window_bounds = array<i64: 2, 32>}, {pipeline_mode = #tpu.pipeline_mode<synchronous>, transform_indices = @transform_13, window_bounds = array<i64: 2, 32>}, {pipeline_mode = #tpu.pipeline_mode<synchronous>, transform_indices = @transform_14, window_bounds = array<i64: 2, 32>}, {pipeline_mode = #tpu.pipeline_mode<synchronous>, transform_indices = @transform_15, window_bounds = array<i64: 1, 32>}, {pipeline_mode = #tpu.pipeline_mode<synchronous>, transform_indices = @transform_16, window_bounds = array<i64: 1, 32>}, {pipeline_mode = #tpu.pipeline_mode<synchronous>, transform_indices = @transform_17, window_bounds = array<i64: 16, 32>}]} {
    %c0 = arith.constant 0 : index
    %c0_0 = arith.constant 0 : index
    %0 = vector.load %arg2[%c0, %c0_0] : memref<16x32xf32, #tpu.memory_space<vmem>>, vector<16x32xf32>
    %c0_1 = arith.constant 0 : index
    %c0_2 = arith.constant 0 : index
    %1 = vector.load %arg3[%c0_1, %c0_2] : memref<8x32xf32, #tpu.memory_space<vmem>>, vector<8x32xf32>
    %2 = tpu.concatenate %1, %1 in 0 : vector<8x32xf32>, vector<8x32xf32> -> vector<16x32xf32>
    %3 = arith.addf %0, %2 : vector<16x32xf32>
    %c0_3 = arith.constant 0 : index
    %c0_4 = arith.constant 0 : index
    %4 = vector.load %arg1[%c0_3, %c0_4] : memref<16x16xf32, #tpu.memory_space<vmem>>, vector<16x16xf32>
    %5 = vector.shape_cast %4 : vector<16x16xf32> to vector<1x16x16xf32>
    %6 = vector.shape_cast %5 : vector<1x16x16xf32> to vector<1x16x16xf32>
    %7 = vector.broadcast %6 : vector<1x16x16xf32> to vector<4x16x16xf32>
    %c0_5 = arith.constant 0 : index
    %c0_6 = arith.constant 0 : index
    %8 = vector.load %arg12[%c0_5, %c0_6] : memref<2x32xf32, #tpu.memory_space<vmem>>, vector<1x32xf32>
    %c0_7 = arith.constant 0 : index
    %c0_8 = arith.constant 0 : index
    %9 = vector.load %arg13[%c0_7, %c0_8] : memref<2x32xf32, #tpu.memory_space<vmem>>, vector<1x32xf32>
    %cst = arith.constant dense<0.000000e+00> : vector<16xf32>
    %10 = vector.multi_reduction <add>, %3, %cst [1] : vector<16x32xf32> to vector<16xf32>
    %11 = vector.shape_cast %10 : vector<16xf32> to vector<16x1xf32>
    %cst_9 = arith.constant 3.200000e+01 : f32
    %12 = vector.broadcast %cst_9 : f32 to vector<16x1xf32>
    %13 = arith.divf %11, %12 : vector<16x1xf32>
    %14 = vector.broadcast %13 : vector<16x1xf32> to vector<16x32xf32>
    %15 = arith.subf %3, %14 : vector<16x32xf32>
    %16 = arith.mulf %15, %15 : vector<16x32xf32>
    %cst_10 = arith.constant dense<0.000000e+00> : vector<16xf32>
    %17 = vector.multi_reduction <add>, %16, %cst_10 [1] : vector<16x32xf32> to vector<16xf32>
    %18 = vector.shape_cast %17 : vector<16xf32> to vector<16x1xf32>
    %cst_11 = arith.constant 3.200000e+01 : f32
    %19 = vector.broadcast %cst_11 : f32 to vector<16x1xf32>
    %20 = arith.divf %18, %19 : vector<16x1xf32>
    %21 = vector.broadcast %13 : vector<16x1xf32> to vector<16x32xf32>
    %22 = arith.subf %3, %21 : vector<16x32xf32>
    %cst_12 = arith.constant 9.99999974E-6 : f32
    %23 = vector.broadcast %cst_12 : f32 to vector<16x1xf32>
    %24 = arith.addf %20, %23 : vector<16x1xf32>
    %25 = math.rsqrt %24 : vector<16x1xf32>
    %26 = vector.broadcast %25 : vector<16x1xf32> to vector<16x32xf32>
    %27 = arith.mulf %22, %26 : vector<16x32xf32>
    %28 = vector.broadcast %8 : vector<1x32xf32> to vector<16x32xf32>
    %29 = arith.mulf %27, %28 : vector<16x32xf32>
    %30 = vector.broadcast %9 : vector<1x32xf32> to vector<16x32xf32>
    %31 = arith.addf %29, %30 : vector<16x32xf32>
    %c0_13 = arith.constant 0 : index
    %c0_14 = arith.constant 0 : index
    %c0_15 = arith.constant 0 : index
    %32 = vector.load %arg4[%c0_13, %c0_14, %c0_15] : memref<2x32x96xf32, #tpu.memory_space<vmem>>, vector<1x32x96xf32>
    %33 = vector.shape_cast %32 : vector<1x32x96xf32> to vector<32x96xf32>
    %cst_16 = arith.constant dense<0.000000e+00> : vector<16x96xf32>
    %34 = tpu.matmul %31, %33, %cst_16 {dimension_numbers = #tpu.dot_dimension_numbers<[1], [0], [0], [1], [0, 0, 1, 1], [], []>} : vector<16x32xf32>, vector<32x96xf32>, vector<16x96xf32> -> vector<16x96xf32>
    %c0_17 = arith.constant 0 : index
    %c0_18 = arith.constant 0 : index
    %35 = vector.load %arg5[%c0_17, %c0_18] : memref<2x96xf32, #tpu.memory_space<vmem>>, vector<1x96xf32>
    %36 = vector.broadcast %35 : vector<1x96xf32> to vector<16x96xf32>
    %37 = arith.addf %34, %36 : vector<16x96xf32>
    %38 = vector.extract_strided_slice %37 {offsets = [0, 0], sizes = [16, 8], strides = [1, 1]} : vector<16x96xf32> to vector<16x8xf32>
    %39 = vector.extract_strided_slice %37 {offsets = [0, 8], sizes = [16, 8], strides = [1, 1]} : vector<16x96xf32> to vector<16x8xf32>
    %40 = vector.extract_strided_slice %37 {offsets = [0, 16], sizes = [16, 8], strides = [1, 1]} : vector<16x96xf32> to vector<16x8xf32>
    %41 = vector.extract_strided_slice %37 {offsets = [0, 24], sizes = [16, 8], strides = [1, 1]} : vector<16x96xf32> to vector<16x8xf32>
    %42 = vector.shape_cast %38 : vector<16x8xf32> to vector<1x16x8xf32>
    %43 = vector.shape_cast %39 : vector<16x8xf32> to vector<1x16x8xf32>
    %44 = vector.shape_cast %40 : vector<16x8xf32> to vector<1x16x8xf32>
    %45 = vector.shape_cast %41 : vector<16x8xf32> to vector<1x16x8xf32>
    %46 = tpu.concatenate %42, %43, %44, %45 in 0 : vector<1x16x8xf32>, vector<1x16x8xf32>, vector<1x16x8xf32>, vector<1x16x8xf32> -> vector<4x16x8xf32>
    %cst_19 = arith.constant 0.353553385 : f32
    %47 = vector.broadcast %cst_19 : f32 to vector<4x16x8xf32>
    %48 = arith.mulf %46, %47 : vector<4x16x8xf32>
    %49 = vector.extract_strided_slice %37 {offsets = [0, 32], sizes = [16, 8], strides = [1, 1]} : vector<16x96xf32> to vector<16x8xf32>
    %50 = vector.extract_strided_slice %37 {offsets = [0, 40], sizes = [16, 8], strides = [1, 1]} : vector<16x96xf32> to vector<16x8xf32>
    %51 = vector.extract_strided_slice %37 {offsets = [0, 48], sizes = [16, 8], strides = [1, 1]} : vector<16x96xf32> to vector<16x8xf32>
    %52 = vector.extract_strided_slice %37 {offsets = [0, 56], sizes = [16, 8], strides = [1, 1]} : vector<16x96xf32> to vector<16x8xf32>
    %53 = vector.shape_cast %49 : vector<16x8xf32> to vector<1x16x8xf32>
    %54 = vector.shape_cast %50 : vector<16x8xf32> to vector<1x16x8xf32>
    %55 = vector.shape_cast %51 : vector<16x8xf32> to vector<1x16x8xf32>
    %56 = vector.shape_cast %52 : vector<16x8xf32> to vector<1x16x8xf32>
    %57 = tpu.concatenate %53, %54, %55, %56 in 0 : vector<1x16x8xf32>, vector<1x16x8xf32>, vector<1x16x8xf32>, vector<1x16x8xf32> -> vector<4x16x8xf32>
    %58 = vector.extract_strided_slice %37 {offsets = [0, 64], sizes = [16, 8], strides = [1, 1]} : vector<16x96xf32> to vector<16x8xf32>
    %59 = vector.extract_strided_slice %37 {offsets = [0, 72], sizes = [16, 8], strides = [1, 1]} : vector<16x96xf32> to vector<16x8xf32>
    %60 = vector.extract_strided_slice %37 {offsets = [0, 80], sizes = [16, 8], strides = [1, 1]} : vector<16x96xf32> to vector<16x8xf32>
    %61 = vector.extract_strided_slice %37 {offsets = [0, 88], sizes = [16, 8], strides = [1, 1]} : vector<16x96xf32> to vector<16x8xf32>
    %62 = vector.shape_cast %58 : vector<16x8xf32> to vector<1x16x8xf32>
    %63 = vector.shape_cast %59 : vector<16x8xf32> to vector<1x16x8xf32>
    %64 = vector.shape_cast %60 : vector<16x8xf32> to vector<1x16x8xf32>
    %65 = vector.shape_cast %61 : vector<16x8xf32> to vector<1x16x8xf32>
    %66 = tpu.concatenate %62, %63, %64, %65 in 0 : vector<1x16x8xf32>, vector<1x16x8xf32>, vector<1x16x8xf32>, vector<1x16x8xf32> -> vector<4x16x8xf32>
    "tpu.trace_start"() <{level = 10 : i32, message = "hqd,hkd->hqk"}> : () -> ()
    %cst_20 = arith.constant dense<0.000000e+00> : vector<4x16x16xf32>
    %67 = tpu.matmul %48, %57, %cst_20 {dimension_numbers = #tpu.dot_dimension_numbers<[2], [2], [1], [1], [0, 0, 0, 1, 1, 1], [0], [0]>} : vector<4x16x8xf32>, vector<4x16x8xf32>, vector<4x16x16xf32> -> vector<4x16x16xf32>
    "tpu.trace_stop"() : () -> ()
    %68 = arith.addf %67, %7 : vector<4x16x16xf32>
    %cst_21 = arith.constant dense<0xFF800000> : vector<4x16xf32>
    %69 = vector.multi_reduction <maximumf>, %68, %cst_21 [2] : vector<4x16x16xf32> to vector<4x16xf32>
    %70 = vector.shape_cast %69 : vector<4x16xf32> to vector<4x16x1xf32>
    %71 = vector.broadcast %70 : vector<4x16x1xf32> to vector<4x16x16xf32>
    %72 = arith.subf %68, %71 : vector<4x16x16xf32>
    %73 = math.exp %72 : vector<4x16x16xf32>
    %cst_22 = arith.constant dense<0.000000e+00> : vector<4x16xf32>
    %74 = vector.multi_reduction <add>, %73, %cst_22 [2] : vector<4x16x16xf32> to vector<4x16xf32>
    %75 = vector.shape_cast %74 : vector<4x16xf32> to vector<4x16x1xf32>
    %76 = vector.broadcast %75 : vector<4x16x1xf32> to vector<4x16x16xf32>
    %77 = arith.divf %73, %76 : vector<4x16x16xf32>
    "tpu.trace_start"() <{level = 10 : i32, message = "hqk,hkd->hqd"}> : () -> ()
    %cst_23 = arith.constant dense<0.000000e+00> : vector<4x16x8xf32>
    %78 = tpu.matmul %77, %66, %cst_23 {dimension_numbers = #tpu.dot_dimension_numbers<[2], [1], [1], [2], [0, 0, 0, 1, 1, 2], [0], [0]>} : vector<4x16x16xf32>, vector<4x16x8xf32>, vector<4x16x8xf32> -> vector<4x16x8xf32>
    "tpu.trace_stop"() : () -> ()
    %79 = vector.extract_strided_slice %78 {offsets = [0, 0, 0], sizes = [1, 16, 8], strides = [1, 1, 1]} : vector<4x16x8xf32> to vector<1x16x8xf32>
    %80 = vector.shape_cast %79 : vector<1x16x8xf32> to vector<16x8xf32>
    %81 = vector.extract_strided_slice %78 {offsets = [1, 0, 0], sizes = [1, 16, 8], strides = [1, 1, 1]} : vector<4x16x8xf32> to vector<1x16x8xf32>
    %82 = vector.shape_cast %81 : vector<1x16x8xf32> to vector<16x8xf32>
    %83 = vector.extract_strided_slice %78 {offsets = [2, 0, 0], sizes = [1, 16, 8], strides = [1, 1, 1]} : vector<4x16x8xf32> to vector<1x16x8xf32>
    %84 = vector.shape_cast %83 : vector<1x16x8xf32> to vector<16x8xf32>
    %85 = vector.extract_strided_slice %78 {offsets = [3, 0, 0], sizes = [1, 16, 8], strides = [1, 1, 1]} : vector<4x16x8xf32> to vector<1x16x8xf32>
    %86 = vector.shape_cast %85 : vector<1x16x8xf32> to vector<16x8xf32>
    %87 = tpu.concatenate %80, %82, %84, %86 in 1 : vector<16x8xf32>, vector<16x8xf32>, vector<16x8xf32>, vector<16x8xf32> -> vector<16x32xf32>
    %c0_24 = arith.constant 0 : index
    %c0_25 = arith.constant 0 : index
    %c0_26 = arith.constant 0 : index
    %88 = vector.load %arg6[%c0_24, %c0_25, %c0_26] : memref<2x32x32xf32, #tpu.memory_space<vmem>>, vector<1x32x32xf32>
    %89 = vector.shape_cast %88 : vector<1x32x32xf32> to vector<32x32xf32>
    %cst_27 = arith.constant dense<0.000000e+00> : vector<16x32xf32>
    %90 = tpu.matmul %87, %89, %cst_27 {dimension_numbers = #tpu.dot_dimension_numbers<[1], [0], [0], [1], [0, 0, 1, 1], [], []>} : vector<16x32xf32>, vector<32x32xf32>, vector<16x32xf32> -> vector<16x32xf32>
    %c0_28 = arith.constant 0 : index
    %c0_29 = arith.constant 0 : index
    %91 = vector.load %arg7[%c0_28, %c0_29] : memref<2x32xf32, #tpu.memory_space<vmem>>, vector<1x32xf32>
    %92 = vector.broadcast %91 : vector<1x32xf32> to vector<16x32xf32>
    %93 = arith.addf %90, %92 : vector<16x32xf32>
    %94 = arith.addf %3, %93 : vector<16x32xf32>
    %c0_30 = arith.constant 0 : index
    %c0_31 = arith.constant 0 : index
    %95 = vector.load %arg14[%c0_30, %c0_31] : memref<2x32xf32, #tpu.memory_space<vmem>>, vector<1x32xf32>
    %c0_32 = arith.constant 0 : index
    %c0_33 = arith.constant 0 : index
    %96 = vector.load %arg15[%c0_32, %c0_33] : memref<2x32xf32, #tpu.memory_space<vmem>>, vector<1x32xf32>
    %cst_34 = arith.constant dense<0.000000e+00> : vector<16xf32>
    %97 = vector.multi_reduction <add>, %94, %cst_34 [1] : vector<16x32xf32> to vector<16xf32>
    %98 = vector.shape_cast %97 : vector<16xf32> to vector<16x1xf32>
    %cst_35 = arith.constant 3.200000e+01 : f32
    %99 = vector.broadcast %cst_35 : f32 to vector<16x1xf32>
    %100 = arith.divf %98, %99 : vector<16x1xf32>
    %101 = vector.broadcast %100 : vector<16x1xf32> to vector<16x32xf32>
    %102 = arith.subf %94, %101 : vector<16x32xf32>
    %103 = arith.mulf %102, %102 : vector<16x32xf32>
    %cst_36 = arith.constant dense<0.000000e+00> : vector<16xf32>
    %104 = vector.multi_reduction <add>, %103, %cst_36 [1] : vector<16x32xf32> to vector<16xf32>
    %105 = vector.shape_cast %104 : vector<16xf32> to vector<16x1xf32>
    %cst_37 = arith.constant 3.200000e+01 : f32
    %106 = vector.broadcast %cst_37 : f32 to vector<16x1xf32>
    %107 = arith.divf %105, %106 : vector<16x1xf32>
    %108 = vector.broadcast %100 : vector<16x1xf32> to vector<16x32xf32>
    %109 = arith.subf %94, %108 : vector<16x32xf32>
    %cst_38 = arith.constant 9.99999974E-6 : f32
    %110 = vector.broadcast %cst_38 : f32 to vector<16x1xf32>
    %111 = arith.addf %107, %110 : vector<16x1xf32>
    %112 = math.rsqrt %111 : vector<16x1xf32>
    %113 = vector.broadcast %112 : vector<16x1xf32> to vector<16x32xf32>
    %114 = arith.mulf %109, %113 : vector<16x32xf32>
    %115 = vector.broadcast %95 : vector<1x32xf32> to vector<16x32xf32>
    %116 = arith.mulf %114, %115 : vector<16x32xf32>
    %117 = vector.broadcast %96 : vector<1x32xf32> to vector<16x32xf32>
    %118 = arith.addf %116, %117 : vector<16x32xf32>
    %c0_39 = arith.constant 0 : index
    %c0_40 = arith.constant 0 : index
    %c0_41 = arith.constant 0 : index
    %119 = vector.load %arg8[%c0_39, %c0_40, %c0_41] : memref<2x32x64xf32, #tpu.memory_space<vmem>>, vector<1x32x64xf32>
    %120 = vector.shape_cast %119 : vector<1x32x64xf32> to vector<32x64xf32>
    %cst_42 = arith.constant dense<0.000000e+00> : vector<16x64xf32>
    %121 = tpu.matmul %118, %120, %cst_42 {dimension_numbers = #tpu.dot_dimension_numbers<[1], [0], [0], [1], [0, 0, 1, 1], [], []>} : vector<16x32xf32>, vector<32x64xf32>, vector<16x64xf32> -> vector<16x64xf32>
    %c0_43 = arith.constant 0 : index
    %c0_44 = arith.constant 0 : index
    %122 = vector.load %arg9[%c0_43, %c0_44] : memref<2x64xf32, #tpu.memory_space<vmem>>, vector<1x64xf32>
    %123 = vector.broadcast %122 : vector<1x64xf32> to vector<16x64xf32>
    %124 = arith.addf %121, %123 : vector<16x64xf32>
    %cst_45 = arith.constant 0.000000e+00 : f32
    %125 = vector.broadcast %cst_45 : f32 to vector<16x64xf32>
    %126 = arith.maximumf %124, %125 : vector<16x64xf32>
    %c0_46 = arith.constant 0 : index
    %c0_47 = arith.constant 0 : index
    %c0_48 = arith.constant 0 : index
    %127 = vector.load %arg10[%c0_46, %c0_47, %c0_48] : memref<2x64x32xf32, #tpu.memory_space<vmem>>, vector<1x64x32xf32>
    %128 = vector.shape_cast %127 : vector<1x64x32xf32> to vector<64x32xf32>
    %cst_49 = arith.constant dense<0.000000e+00> : vector<16x32xf32>
    %129 = tpu.matmul %126, %128, %cst_49 {dimension_numbers = #tpu.dot_dimension_numbers<[1], [0], [0], [1], [0, 0, 1, 1], [], []>} : vector<16x64xf32>, vector<64x32xf32>, vector<16x32xf32> -> vector<16x32xf32>
    %c0_50 = arith.constant 0 : index
    %c0_51 = arith.constant 0 : index
    %130 = vector.load %arg11[%c0_50, %c0_51] : memref<2x32xf32, #tpu.memory_space<vmem>>, vector<1x32xf32>
    %131 = vector.broadcast %130 : vector<1x32xf32> to vector<16x32xf32>
    %132 = arith.addf %129, %131 : vector<16x32xf32>
    %133 = arith.addf %94, %132 : vector<16x32xf32>
    %c1 = arith.constant 1 : index
    %c0_52 = arith.constant 0 : index
    %134 = vector.load %arg12[%c1, %c0_52] : memref<2x32xf32, #tpu.memory_space<vmem>>, vector<1x32xf32>
    %c1_53 = arith.constant 1 : index
    %c0_54 = arith.constant 0 : index
    %135 = vector.load %arg13[%c1_53, %c0_54] : memref<2x32xf32, #tpu.memory_space<vmem>>, vector<1x32xf32>
    %cst_55 = arith.constant dense<0.000000e+00> : vector<16xf32>
    %136 = vector.multi_reduction <add>, %133, %cst_55 [1] : vector<16x32xf32> to vector<16xf32>
    %137 = vector.shape_cast %136 : vector<16xf32> to vector<16x1xf32>
    %cst_56 = arith.constant 3.200000e+01 : f32
    %138 = vector.broadcast %cst_56 : f32 to vector<16x1xf32>
    %139 = arith.divf %137, %138 : vector<16x1xf32>
    %140 = vector.broadcast %139 : vector<16x1xf32> to vector<16x32xf32>
    %141 = arith.subf %133, %140 : vector<16x32xf32>
    %142 = arith.mulf %141, %141 : vector<16x32xf32>
    %cst_57 = arith.constant dense<0.000000e+00> : vector<16xf32>
    %143 = vector.multi_reduction <add>, %142, %cst_57 [1] : vector<16x32xf32> to vector<16xf32>
    %144 = vector.shape_cast %143 : vector<16xf32> to vector<16x1xf32>
    %cst_58 = arith.constant 3.200000e+01 : f32
    %145 = vector.broadcast %cst_58 : f32 to vector<16x1xf32>
    %146 = arith.divf %144, %145 : vector<16x1xf32>
    %147 = vector.broadcast %139 : vector<16x1xf32> to vector<16x32xf32>
    %148 = arith.subf %133, %147 : vector<16x32xf32>
    %cst_59 = arith.constant 9.99999974E-6 : f32
    %149 = vector.broadcast %cst_59 : f32 to vector<16x1xf32>
    %150 = arith.addf %146, %149 : vector<16x1xf32>
    %151 = math.rsqrt %150 : vector<16x1xf32>
    %152 = vector.broadcast %151 : vector<16x1xf32> to vector<16x32xf32>
    %153 = arith.mulf %148, %152 : vector<16x32xf32>
    %154 = vector.broadcast %134 : vector<1x32xf32> to vector<16x32xf32>
    %155 = arith.mulf %153, %154 : vector<16x32xf32>
    %156 = vector.broadcast %135 : vector<1x32xf32> to vector<16x32xf32>
    %157 = arith.addf %155, %156 : vector<16x32xf32>
    %c1_60 = arith.constant 1 : index
    %c0_61 = arith.constant 0 : index
    %c0_62 = arith.constant 0 : index
    %158 = vector.load %arg4[%c1_60, %c0_61, %c0_62] : memref<2x32x96xf32, #tpu.memory_space<vmem>>, vector<1x32x96xf32>
    %159 = vector.shape_cast %158 : vector<1x32x96xf32> to vector<32x96xf32>
    %cst_63 = arith.constant dense<0.000000e+00> : vector<16x96xf32>
    %160 = tpu.matmul %157, %159, %cst_63 {dimension_numbers = #tpu.dot_dimension_numbers<[1], [0], [0], [1], [0, 0, 1, 1], [], []>} : vector<16x32xf32>, vector<32x96xf32>, vector<16x96xf32> -> vector<16x96xf32>
    %c1_64 = arith.constant 1 : index
    %c0_65 = arith.constant 0 : index
    %161 = vector.load %arg5[%c1_64, %c0_65] : memref<2x96xf32, #tpu.memory_space<vmem>>, vector<1x96xf32>
    %162 = vector.broadcast %161 : vector<1x96xf32> to vector<16x96xf32>
    %163 = arith.addf %160, %162 : vector<16x96xf32>
    %164 = vector.extract_strided_slice %163 {offsets = [0, 0], sizes = [16, 8], strides = [1, 1]} : vector<16x96xf32> to vector<16x8xf32>
    %165 = vector.extract_strided_slice %163 {offsets = [0, 8], sizes = [16, 8], strides = [1, 1]} : vector<16x96xf32> to vector<16x8xf32>
    %166 = vector.extract_strided_slice %163 {offsets = [0, 16], sizes = [16, 8], strides = [1, 1]} : vector<16x96xf32> to vector<16x8xf32>
    %167 = vector.extract_strided_slice %163 {offsets = [0, 24], sizes = [16, 8], strides = [1, 1]} : vector<16x96xf32> to vector<16x8xf32>
    %168 = vector.shape_cast %164 : vector<16x8xf32> to vector<1x16x8xf32>
    %169 = vector.shape_cast %165 : vector<16x8xf32> to vector<1x16x8xf32>
    %170 = vector.shape_cast %166 : vector<16x8xf32> to vector<1x16x8xf32>
    %171 = vector.shape_cast %167 : vector<16x8xf32> to vector<1x16x8xf32>
    %172 = tpu.concatenate %168, %169, %170, %171 in 0 : vector<1x16x8xf32>, vector<1x16x8xf32>, vector<1x16x8xf32>, vector<1x16x8xf32> -> vector<4x16x8xf32>
    %cst_66 = arith.constant 0.353553385 : f32
    %173 = vector.broadcast %cst_66 : f32 to vector<4x16x8xf32>
    %174 = arith.mulf %172, %173 : vector<4x16x8xf32>
    %175 = vector.extract_strided_slice %163 {offsets = [0, 32], sizes = [16, 8], strides = [1, 1]} : vector<16x96xf32> to vector<16x8xf32>
    %176 = vector.extract_strided_slice %163 {offsets = [0, 40], sizes = [16, 8], strides = [1, 1]} : vector<16x96xf32> to vector<16x8xf32>
    %177 = vector.extract_strided_slice %163 {offsets = [0, 48], sizes = [16, 8], strides = [1, 1]} : vector<16x96xf32> to vector<16x8xf32>
    %178 = vector.extract_strided_slice %163 {offsets = [0, 56], sizes = [16, 8], strides = [1, 1]} : vector<16x96xf32> to vector<16x8xf32>
    %179 = vector.shape_cast %175 : vector<16x8xf32> to vector<1x16x8xf32>
    %180 = vector.shape_cast %176 : vector<16x8xf32> to vector<1x16x8xf32>
    %181 = vector.shape_cast %177 : vector<16x8xf32> to vector<1x16x8xf32>
    %182 = vector.shape_cast %178 : vector<16x8xf32> to vector<1x16x8xf32>
    %183 = tpu.concatenate %179, %180, %181, %182 in 0 : vector<1x16x8xf32>, vector<1x16x8xf32>, vector<1x16x8xf32>, vector<1x16x8xf32> -> vector<4x16x8xf32>
    %184 = vector.extract_strided_slice %163 {offsets = [0, 64], sizes = [16, 8], strides = [1, 1]} : vector<16x96xf32> to vector<16x8xf32>
    %185 = vector.extract_strided_slice %163 {offsets = [0, 72], sizes = [16, 8], strides = [1, 1]} : vector<16x96xf32> to vector<16x8xf32>
    %186 = vector.extract_strided_slice %163 {offsets = [0, 80], sizes = [16, 8], strides = [1, 1]} : vector<16x96xf32> to vector<16x8xf32>
    %187 = vector.extract_strided_slice %163 {offsets = [0, 88], sizes = [16, 8], strides = [1, 1]} : vector<16x96xf32> to vector<16x8xf32>
    %188 = vector.shape_cast %184 : vector<16x8xf32> to vector<1x16x8xf32>
    %189 = vector.shape_cast %185 : vector<16x8xf32> to vector<1x16x8xf32>
    %190 = vector.shape_cast %186 : vector<16x8xf32> to vector<1x16x8xf32>
    %191 = vector.shape_cast %187 : vector<16x8xf32> to vector<1x16x8xf32>
    %192 = tpu.concatenate %188, %189, %190, %191 in 0 : vector<1x16x8xf32>, vector<1x16x8xf32>, vector<1x16x8xf32>, vector<1x16x8xf32> -> vector<4x16x8xf32>
    "tpu.trace_start"() <{level = 10 : i32, message = "hqd,hkd->hqk"}> : () -> ()
    %cst_67 = arith.constant dense<0.000000e+00> : vector<4x16x16xf32>
    %193 = tpu.matmul %174, %183, %cst_67 {dimension_numbers = #tpu.dot_dimension_numbers<[2], [2], [1], [1], [0, 0, 0, 1, 1, 1], [0], [0]>} : vector<4x16x8xf32>, vector<4x16x8xf32>, vector<4x16x16xf32> -> vector<4x16x16xf32>
    "tpu.trace_stop"() : () -> ()
    %194 = arith.addf %193, %7 : vector<4x16x16xf32>
    %cst_68 = arith.constant dense<0xFF800000> : vector<4x16xf32>
    %195 = vector.multi_reduction <maximumf>, %194, %cst_68 [2] : vector<4x16x16xf32> to vector<4x16xf32>
    %196 = vector.shape_cast %195 : vector<4x16xf32> to vector<4x16x1xf32>
    %197 = vector.broadcast %196 : vector<4x16x1xf32> to vector<4x16x16xf32>
    %198 = arith.subf %194, %197 : vector<4x16x16xf32>
    %199 = math.exp %198 : vector<4x16x16xf32>
    %cst_69 = arith.constant dense<0.000000e+00> : vector<4x16xf32>
    %200 = vector.multi_reduction <add>, %199, %cst_69 [2] : vector<4x16x16xf32> to vector<4x16xf32>
    %201 = vector.shape_cast %200 : vector<4x16xf32> to vector<4x16x1xf32>
    %202 = vector.broadcast %201 : vector<4x16x1xf32> to vector<4x16x16xf32>
    %203 = arith.divf %199, %202 : vector<4x16x16xf32>
    "tpu.trace_start"() <{level = 10 : i32, message = "hqk,hkd->hqd"}> : () -> ()
    %cst_70 = arith.constant dense<0.000000e+00> : vector<4x16x8xf32>
    %204 = tpu.matmul %203, %192, %cst_70 {dimension_numbers = #tpu.dot_dimension_numbers<[2], [1], [1], [2], [0, 0, 0, 1, 1, 2], [0], [0]>} : vector<4x16x16xf32>, vector<4x16x8xf32>, vector<4x16x8xf32> -> vector<4x16x8xf32>
    "tpu.trace_stop"() : () -> ()
    %205 = vector.extract_strided_slice %204 {offsets = [0, 0, 0], sizes = [1, 16, 8], strides = [1, 1, 1]} : vector<4x16x8xf32> to vector<1x16x8xf32>
    %206 = vector.shape_cast %205 : vector<1x16x8xf32> to vector<16x8xf32>
    %207 = vector.extract_strided_slice %204 {offsets = [1, 0, 0], sizes = [1, 16, 8], strides = [1, 1, 1]} : vector<4x16x8xf32> to vector<1x16x8xf32>
    %208 = vector.shape_cast %207 : vector<1x16x8xf32> to vector<16x8xf32>
    %209 = vector.extract_strided_slice %204 {offsets = [2, 0, 0], sizes = [1, 16, 8], strides = [1, 1, 1]} : vector<4x16x8xf32> to vector<1x16x8xf32>
    %210 = vector.shape_cast %209 : vector<1x16x8xf32> to vector<16x8xf32>
    %211 = vector.extract_strided_slice %204 {offsets = [3, 0, 0], sizes = [1, 16, 8], strides = [1, 1, 1]} : vector<4x16x8xf32> to vector<1x16x8xf32>
    %212 = vector.shape_cast %211 : vector<1x16x8xf32> to vector<16x8xf32>
    %213 = tpu.concatenate %206, %208, %210, %212 in 1 : vector<16x8xf32>, vector<16x8xf32>, vector<16x8xf32>, vector<16x8xf32> -> vector<16x32xf32>
    %c1_71 = arith.constant 1 : index
    %c0_72 = arith.constant 0 : index
    %c0_73 = arith.constant 0 : index
    %214 = vector.load %arg6[%c1_71, %c0_72, %c0_73] : memref<2x32x32xf32, #tpu.memory_space<vmem>>, vector<1x32x32xf32>
    %215 = vector.shape_cast %214 : vector<1x32x32xf32> to vector<32x32xf32>
    %cst_74 = arith.constant dense<0.000000e+00> : vector<16x32xf32>
    %216 = tpu.matmul %213, %215, %cst_74 {dimension_numbers = #tpu.dot_dimension_numbers<[1], [0], [0], [1], [0, 0, 1, 1], [], []>} : vector<16x32xf32>, vector<32x32xf32>, vector<16x32xf32> -> vector<16x32xf32>
    %c1_75 = arith.constant 1 : index
    %c0_76 = arith.constant 0 : index
    %217 = vector.load %arg7[%c1_75, %c0_76] : memref<2x32xf32, #tpu.memory_space<vmem>>, vector<1x32xf32>
    %218 = vector.broadcast %217 : vector<1x32xf32> to vector<16x32xf32>
    %219 = arith.addf %216, %218 : vector<16x32xf32>
    %220 = arith.addf %133, %219 : vector<16x32xf32>
    %c1_77 = arith.constant 1 : index
    %c0_78 = arith.constant 0 : index
    %221 = vector.load %arg14[%c1_77, %c0_78] : memref<2x32xf32, #tpu.memory_space<vmem>>, vector<1x32xf32>
    %c1_79 = arith.constant 1 : index
    %c0_80 = arith.constant 0 : index
    %222 = vector.load %arg15[%c1_79, %c0_80] : memref<2x32xf32, #tpu.memory_space<vmem>>, vector<1x32xf32>
    %cst_81 = arith.constant dense<0.000000e+00> : vector<16xf32>
    %223 = vector.multi_reduction <add>, %220, %cst_81 [1] : vector<16x32xf32> to vector<16xf32>
    %224 = vector.shape_cast %223 : vector<16xf32> to vector<16x1xf32>
    %cst_82 = arith.constant 3.200000e+01 : f32
    %225 = vector.broadcast %cst_82 : f32 to vector<16x1xf32>
    %226 = arith.divf %224, %225 : vector<16x1xf32>
    %227 = vector.broadcast %226 : vector<16x1xf32> to vector<16x32xf32>
    %228 = arith.subf %220, %227 : vector<16x32xf32>
    %229 = arith.mulf %228, %228 : vector<16x32xf32>
    %cst_83 = arith.constant dense<0.000000e+00> : vector<16xf32>
    %230 = vector.multi_reduction <add>, %229, %cst_83 [1] : vector<16x32xf32> to vector<16xf32>
    %231 = vector.shape_cast %230 : vector<16xf32> to vector<16x1xf32>
    %cst_84 = arith.constant 3.200000e+01 : f32
    %232 = vector.broadcast %cst_84 : f32 to vector<16x1xf32>
    %233 = arith.divf %231, %232 : vector<16x1xf32>
    %234 = vector.broadcast %226 : vector<16x1xf32> to vector<16x32xf32>
    %235 = arith.subf %220, %234 : vector<16x32xf32>
    %cst_85 = arith.constant 9.99999974E-6 : f32
    %236 = vector.broadcast %cst_85 : f32 to vector<16x1xf32>
    %237 = arith.addf %233, %236 : vector<16x1xf32>
    %238 = math.rsqrt %237 : vector<16x1xf32>
    %239 = vector.broadcast %238 : vector<16x1xf32> to vector<16x32xf32>
    %240 = arith.mulf %235, %239 : vector<16x32xf32>
    %241 = vector.broadcast %221 : vector<1x32xf32> to vector<16x32xf32>
    %242 = arith.mulf %240, %241 : vector<16x32xf32>
    %243 = vector.broadcast %222 : vector<1x32xf32> to vector<16x32xf32>
    %244 = arith.addf %242, %243 : vector<16x32xf32>
    %c1_86 = arith.constant 1 : index
    %c0_87 = arith.constant 0 : index
    %c0_88 = arith.constant 0 : index
    %245 = vector.load %arg8[%c1_86, %c0_87, %c0_88] : memref<2x32x64xf32, #tpu.memory_space<vmem>>, vector<1x32x64xf32>
    %246 = vector.shape_cast %245 : vector<1x32x64xf32> to vector<32x64xf32>
    %cst_89 = arith.constant dense<0.000000e+00> : vector<16x64xf32>
    %247 = tpu.matmul %244, %246, %cst_89 {dimension_numbers = #tpu.dot_dimension_numbers<[1], [0], [0], [1], [0, 0, 1, 1], [], []>} : vector<16x32xf32>, vector<32x64xf32>, vector<16x64xf32> -> vector<16x64xf32>
    %c1_90 = arith.constant 1 : index
    %c0_91 = arith.constant 0 : index
    %248 = vector.load %arg9[%c1_90, %c0_91] : memref<2x64xf32, #tpu.memory_space<vmem>>, vector<1x64xf32>
    %249 = vector.broadcast %248 : vector<1x64xf32> to vector<16x64xf32>
    %250 = arith.addf %247, %249 : vector<16x64xf32>
    %cst_92 = arith.constant 0.000000e+00 : f32
    %251 = vector.broadcast %cst_92 : f32 to vector<16x64xf32>
    %252 = arith.maximumf %250, %251 : vector<16x64xf32>
    %c1_93 = arith.constant 1 : index
    %c0_94 = arith.constant 0 : index
    %c0_95 = arith.constant 0 : index
    %253 = vector.load %arg10[%c1_93, %c0_94, %c0_95] : memref<2x64x32xf32, #tpu.memory_space<vmem>>, vector<1x64x32xf32>
    %254 = vector.shape_cast %253 : vector<1x64x32xf32> to vector<64x32xf32>
    %cst_96 = arith.constant dense<0.000000e+00> : vector<16x32xf32>
    %255 = tpu.matmul %252, %254, %cst_96 {dimension_numbers = #tpu.dot_dimension_numbers<[1], [0], [0], [1], [0, 0, 1, 1], [], []>} : vector<16x64xf32>, vector<64x32xf32>, vector<16x32xf32> -> vector<16x32xf32>
    %c1_97 = arith.constant 1 : index
    %c0_98 = arith.constant 0 : index
    %256 = vector.load %arg11[%c1_97, %c0_98] : memref<2x32xf32, #tpu.memory_space<vmem>>, vector<1x32xf32>
    %257 = vector.broadcast %256 : vector<1x32xf32> to vector<16x32xf32>
    %258 = arith.addf %255, %257 : vector<16x32xf32>
    %259 = arith.addf %220, %258 : vector<16x32xf32>
    %c0_99 = arith.constant 0 : index
    %c0_100 = arith.constant 0 : index
    %260 = vector.load %arg16[%c0_99, %c0_100] : memref<1x32xf32, #tpu.memory_space<vmem>>, vector<1x32xf32>
    %c0_101 = arith.constant 0 : index
    %c0_102 = arith.constant 0 : index
    %261 = vector.load %arg17[%c0_101, %c0_102] : memref<1x32xf32, #tpu.memory_space<vmem>>, vector<1x32xf32>
    %cst_103 = arith.constant dense<0.000000e+00> : vector<16xf32>
    %262 = vector.multi_reduction <add>, %259, %cst_103 [1] : vector<16x32xf32> to vector<16xf32>
    %263 = vector.shape_cast %262 : vector<16xf32> to vector<16x1xf32>
    %cst_104 = arith.constant 3.200000e+01 : f32
    %264 = vector.broadcast %cst_104 : f32 to vector<16x1xf32>
    %265 = arith.divf %263, %264 : vector<16x1xf32>
    %266 = vector.broadcast %265 : vector<16x1xf32> to vector<16x32xf32>
    %267 = arith.subf %259, %266 : vector<16x32xf32>
    %268 = arith.mulf %267, %267 : vector<16x32xf32>
    %cst_105 = arith.constant dense<0.000000e+00> : vector<16xf32>
    %269 = vector.multi_reduction <add>, %268, %cst_105 [1] : vector<16x32xf32> to vector<16xf32>
    %270 = vector.shape_cast %269 : vector<16xf32> to vector<16x1xf32>
    %cst_106 = arith.constant 3.200000e+01 : f32
    %271 = vector.broadcast %cst_106 : f32 to vector<16x1xf32>
    %272 = arith.divf %270, %271 : vector<16x1xf32>
    %273 = vector.broadcast %265 : vector<16x1xf32> to vector<16x32xf32>
    %274 = arith.subf %259, %273 : vector<16x32xf32>
    %cst_107 = arith.constant 9.99999974E-6 : f32
    %275 = vector.broadcast %cst_107 : f32 to vector<16x1xf32>
    %276 = arith.addf %272, %275 : vector<16x1xf32>
    %277 = math.rsqrt %276 : vector<16x1xf32>
    %278 = vector.broadcast %277 : vector<16x1xf32> to vector<16x32xf32>
    %279 = arith.mulf %274, %278 : vector<16x32xf32>
    %280 = vector.broadcast %260 : vector<1x32xf32> to vector<16x32xf32>
    %281 = arith.mulf %279, %280 : vector<16x32xf32>
    %282 = vector.broadcast %261 : vector<1x32xf32> to vector<16x32xf32>
    %283 = arith.addf %281, %282 : vector<16x32xf32>
    %c0_108 = arith.constant 0 : index
    %c0_109 = arith.constant 0 : index
    %284 = vector.load %arg18[%c0_108, %c0_109] : memref<16x32xf32, #tpu.memory_space<vmem>>, vector<16x32xf32>
    tpu.vector_store %arg18[%c0_108, %c0_109], %283 {strides = array<i32>} : memref<16x32xf32, #tpu.memory_space<vmem>>, vector<16x32xf32>,
    return
  }
  func.func @transform_0(%arg0: i32) -> (i32, i32) {
    %c0_i32 = arith.constant 0 : i32
    %c0_i32_0 = arith.constant 0 : i32
    %c0_i32_1 = arith.constant 0 : i32
    return %c0_i32, %c0_i32_0 : i32, i32
  }
  func.func @transform_1(%arg0: i32) -> (i32, i32) {
    %c0_i32 = arith.constant 0 : i32
    %c0_i32_0 = arith.constant 0 : i32
    %c0_i32_1 = arith.constant 0 : i32
    return %c0_i32, %c0_i32_0 : i32, i32
  }
  func.func @transform_2(%arg0: i32) -> (i32, i32) {
    %c0_i32 = arith.constant 0 : i32
    %c0_i32_0 = arith.constant 0 : i32
    %c0_i32_1 = arith.constant 0 : i32
    return %c0_i32, %c0_i32_0 : i32, i32
  }
  func.func @transform_3(%arg0: i32) -> (i32, i32, i32) {
    %c0_i32 = arith.constant 0 : i32
    %c0_i32_0 = arith.constant 0 : i32
    %c0_i32_1 = arith.constant 0 : i32
    %c0_i32_2 = arith.constant 0 : i32
    return %c0_i32, %c0_i32_0, %c0_i32_1 : i32, i32, i32
  }
  func.func @transform_4(%arg0: i32) -> (i32, i32) {
    %c0_i32 = arith.constant 0 : i32
    %c0_i32_0 = arith.constant 0 : i32
    %c0_i32_1 = arith.constant 0 : i32
    return %c0_i32, %c0_i32_0 : i32, i32
  }
  func.func @transform_5(%arg0: i32) -> (i32, i32, i32) {
    %c0_i32 = arith.constant 0 : i32
    %c0_i32_0 = arith.constant 0 : i32
    %c0_i32_1 = arith.constant 0 : i32
    %c0_i32_2 = arith.constant 0 : i32
    return %c0_i32, %c0_i32_0, %c0_i32_1 : i32, i32, i32
  }
  func.func @transform_6(%arg0: i32) -> (i32, i32) {
    %c0_i32 = arith.constant 0 : i32
    %c0_i32_0 = arith.constant 0 : i32
    %c0_i32_1 = arith.constant 0 : i32
    return %c0_i32, %c0_i32_0 : i32, i32
  }
  func.func @transform_7(%arg0: i32) -> (i32, i32, i32) {
    %c0_i32 = arith.constant 0 : i32
    %c0_i32_0 = arith.constant 0 : i32
    %c0_i32_1 = arith.constant 0 : i32
    %c0_i32_2 = arith.constant 0 : i32
    return %c0_i32, %c0_i32_0, %c0_i32_1 : i32, i32, i32
  }
  func.func @transform_8(%arg0: i32) -> (i32, i32) {
    %c0_i32 = arith.constant 0 : i32
    %c0_i32_0 = arith.constant 0 : i32
    %c0_i32_1 = arith.constant 0 : i32
    return %c0_i32, %c0_i32_0 : i32, i32
  }
  func.func @transform_9(%arg0: i32) -> (i32, i32, i32) {
    %c0_i32 = arith.constant 0 : i32
    %c0_i32_0 = arith.constant 0 : i32
    %c0_i32_1 = arith.constant 0 : i32
    %c0_i32_2 = arith.constant 0 : i32
    return %c0_i32, %c0_i32_0, %c0_i32_1 : i32, i32, i32
  }
  func.func @transform_10(%arg0: i32) -> (i32, i32) {
    %c0_i32 = arith.constant 0 : i32
    %c0_i32_0 = arith.constant 0 : i32
    %c0_i32_1 = arith.constant 0 : i32
    return %c0_i32, %c0_i32_0 : i32, i32
  }
  func.func @transform_11(%arg0: i32) -> (i32, i32) {
    %c0_i32 = arith.constant 0 : i32
    %c0_i32_0 = arith.constant 0 : i32
    %c0_i32_1 = arith.constant 0 : i32
    return %c0_i32, %c0_i32_0 : i32, i32
  }
  func.func @transform_12(%arg0: i32) -> (i32, i32) {
    %c0_i32 = arith.constant 0 : i32
    %c0_i32_0 = arith.constant 0 : i32
    %c0_i32_1 = arith.constant 0 : i32
    return %c0_i32, %c0_i32_0 : i32, i32
  }
  func.func @transform_13(%arg0: i32) -> (i32, i32) {
    %c0_i32 = arith.constant 0 : i32
    %c0_i32_0 = arith.constant 0 : i32
    %c0_i32_1 = arith.constant 0 : i32
    return %c0_i32, %c0_i32_0 : i32, i32
  }
  func.func @transform_14(%arg0: i32) -> (i32, i32) {
    %c0_i32 = arith.constant 0 : i32
    %c0_i32_0 = arith.constant 0 : i32
    %c0_i32_1 = arith.constant 0 : i32
    return %c0_i32, %c0_i32_0 : i32, i32
  }
  func.func @transform_15(%arg0: i32) -> (i32, i32) {
    %c0_i32 = arith.constant 0 : i32
    %c0_i32_0 = arith.constant 0 : i32
    %c0_i32_1 = arith.constant 0 : i32
    return %c0_i32, %c0_i32_0 : i32, i32
  }
  func.func @transform_16(%arg0: i32) -> (i32, i32) {
    %c0_i32 = arith.constant 0 : i32
    %c0_i32_0 = arith.constant 0 : i32
    %c0_i32_1 = arith.constant 0 : i32
    return %c0_i32, %c0_i32_0 : i32, i32
  }
  func.func @transform_17(%arg0: i32) -> (i32, i32) {
    %c0_i32 = arith.constant 0 : i32
    %c0_i32_0 = arith.constant 0 : i32
    %c0_i32_1 = arith.constant 0 : i32
    return %c0_i32, %c0_i32_0 : i32, i32
  }
}

</mosaic_0001>

<bundles_post_ra>
// kernel: tpu_custom_call.1
= control target key start
LH: loop header
LB: loop body
LE: loop exit
PB: predicated region body
PF: predicated region fallthrough
CT: control target
= control target key end

     0   :  { %s4319_s0 = inlined_call_operand.hbm [shape: f32[16,16], index: 0, kind: input, shape index: {}]   ;;  %s4320_s1 = inlined_call_operand.hbm [shape: f32[16,32], index: 1, kind: input, shape index: {}]   ;;  %s4321_s2 = inlined_call_operand.hbm [shape: f32[8,32], index: 2, kind: input, shape index: {}]   ;;  %s4322_s3 = inlined_call_operand.vmem [shape: f32[2,32,96], index: 3, kind: input, shape index: {}]   ;;  %s4323_s4 = inlined_call_operand.vmem [shape: f32[2,96], index: 4, kind: input, shape index: {}]   ;;  %s4324_s5 = inlined_call_operand.vmem [shape: f32[2,32,32], index: 5, kind: input, shape index: {}]   ;;  %s4325_s6 = inlined_call_operand.vmem [shape: f32[2,32], index: 6, kind: input, shape index: {}]   ;;  %s4326_s7 = inlined_call_operand.vmem [shape: f32[2,32,64], index: 7, kind: input, shape index: {}]   ;;  %s4327_s8 = inlined_call_operand.vmem [shape: f32[2,64], index: 8, kind: input, shape index: {}]   ;;  %s4328_s9 = inlined_call_operand.vmem [shape: f32[2,64,32], index: 9, kind: input, shape index: {}]   ;;  %s4329_s10 = inlined_call_operand.vmem [shape: f32[2,32], index: 10, kind: input, shape index: {}]   ;;  %s4330_s11 = inlined_call_operand.vmem [shape: f32[2,32], index: 11, kind: input, shape index: {}]   ;;  %s4331_s12 = inlined_call_operand.vmem [shape: f32[2,32], index: 12, kind: input, shape index: {}]   ;;  %s4332_s13 = inlined_call_operand.vmem [shape: f32[2,32], index: 13, kind: input, shape index: {}]   ;;  %s4333_s14 = inlined_call_operand.vmem [shape: f32[2,32], index: 14, kind: input, shape index: {}]   ;;  %s4334_s15 = inlined_call_operand.vmem [shape: f32[1,32], index: 15, kind: input, shape index: {}]   ;;  %s4335_s16 = inlined_call_operand.vmem [shape: f32[1,32], index: 16, kind: input, shape index: {}]   ;;  %s4336_s17 = inlined_call_operand.hbm [shape: f32[16,32], index: 17, kind: output, shape index: {}]  }
   0x1   :  { %4343 = sst [smem:[#allocation12_spill]] %s4319_s0 }
   0x2   :  { %4344 = sst [smem:[#allocation13_spill]] %s4320_s1 }
   0x3   :  { %4345 = sst [smem:[#allocation14_spill]] %s4336_s17 }
   0x4   :  { %22 = vsyncpa [#allocation3], 0 }
   0x5   :  { %23 = vsyncpa [#allocation6], 0 }
   0x6   :  { %24 = vsyncpa [#allocation4], 0  ;;  %s3646_s24 = smov [#allocation5]   ;;  %s3647_s26 = smov [#allocation2]  }
   0x7   :  { %s42_s25 = sshll.u32 %s3646_s24, 4  ;;  %s30_s27 = sshll.u32 %s3647_s26, 4  ;;  %s43_s25 = int_to_ptr.vmem [resolvable:$true] %s42_s25  ;;  %s3749_s27 = int_to_ptr.vmem [resolvable:$true] %s30_s27 }
   0x8   :  { %s4346_s0 = sld [smem:[#allocation13_spill]] }
   0xe   :  { %s3552_s30 = scalar_lea.hbm %s4346_s0, 256 }
   0xf   :  { %p3553_p0 = scmp.ne.s32.totalorder %s4346_s0, %s3552_s30  ;;  %p3556_p1 = scmp.lt.u32.totalorder %s3552_s30, %s4346_s0 }
  0x11   :  { %p3558_p2 = pnand %p3556_p1, %p3553_p0 }
  0x13   :  { %3561 = shalt.err (!%p3558_p2)
}
  0x14   :  { %s3562_s21 = scalar_lea.vmem %s43_s25, 256  ;;  %p3567_p4 = scmp.lt.s32.totalorder %s43_s25, %s43_s25 }
  0x15   :  { %p3563_p3 = scmp.ne.s32.totalorder %s43_s25, %s3562_s21  ;;  %p3568_p5 = scmp.lt.s32.totalorder %s3562_s21, %s3562_s21 }
  0x17   :  { %p3569_p6 = por %p3568_p5, %p3567_p4 }
  0x19   :  { %p3570_p7 = pnand %p3569_p6, %p3563_p3 }
  0x1b   :  { %3573 = shalt.err (!%p3570_p7)
}
  0x1c   :  { %s4340_s22 = smov 128   ;;  %s3649_s23 = smov 8  }
  0x1d   :  { %48 = dma.hbm_to_vmem [thread:$0]  %s4346_s0, 256, %s43_s25, [#allocation6], %s4340_s22, %s4340_s22, %s3649_s23  }
  0x1e   :  { %s4347_s30 = sld [smem:[#allocation12_spill]] }
  0x24   :  { %s3574_s18 = scalar_lea.hbm %s4347_s30, 256 }
  0x25   :  { %p3575_p8 = scmp.ne.s32.totalorder %s4347_s30, %s3574_s18  ;;  %p3578_p9 = scmp.lt.u32.totalorder %s3574_s18, %s4347_s30 }
  0x27   :  { %p3580_p10 = pnand %p3578_p9, %p3575_p8 }
  0x29   :  { %3583 = shalt.err (!%p3580_p10)
}
  0x2a   :  { %s3584_s17 = scalar_lea.vmem %s3749_s27, 256  ;;  %p3589_p12 = scmp.lt.s32.totalorder %s3749_s27, %s3749_s27 }
  0x2b   :  { %p3585_p11 = scmp.ne.s32.totalorder %s3749_s27, %s3584_s17  ;;  %p3590_p13 = scmp.lt.s32.totalorder %s3584_s17, %s3584_s17 }
  0x2d   :  { %p3591_p0 = por %p3590_p13, %p3589_p12 }
  0x2f   :  { %p3592_p1 = pnand %p3591_p0, %p3585_p11 }
  0x31   :  { %3595 = shalt.err (!%p3592_p1)
}
  0x32   :  { %36 = dma.hbm_to_vmem [thread:$0]  %s4347_s30, 256, %s3749_s27, [#allocation3], %s4340_s22, %s4340_s22, %s3649_s23  }
  0x33   :  { %s3650_s24 = smov [#allocation7]   ;;  %s3596_s18 = scalar_lea.hbm %s4321_s2, 128 }
  0x34   :  { %s55_s26 = sshll.u32 %s3650_s24, 4  ;;  %p3597_p2 = scmp.ne.s32.totalorder %s4321_s2, %s3596_s18  ;;  %s56_s26 = int_to_ptr.vmem [resolvable:$true] %s55_s26 }
  0x35   :  { %p3600_p3 = scmp.lt.u32.totalorder %s3596_s18, %s4321_s2 }
  0x37   :  { %p3602_p4 = pnand %p3600_p3, %p3597_p2 }
  0x39   :  { %3605 = shalt.err (!%p3602_p4)
}
  0x3a   :  { %s3606_s21 = scalar_lea.vmem %s56_s26, 128  ;;  %p3611_p6 = scmp.lt.s32.totalorder %s56_s26, %s56_s26 }
  0x3b   :  { %p3607_p5 = scmp.ne.s32.totalorder %s56_s26, %s3606_s21  ;;  %p3612_p7 = scmp.lt.s32.totalorder %s3606_s21, %s3606_s21 }
  0x3d   :  { %p3613_p8 = por %p3612_p7, %p3611_p6 }
  0x3f   :  { %p3614_p9 = pnand %p3613_p8, %p3607_p5 }
  0x41   :  { %3617 = shalt.err (!%p3614_p9)
}
  0x42   :  { %58 = dma.hbm_to_vmem [thread:$0]  %s4321_s2, 128, %s56_s26, [#allocation6]  }
  0x43   :  { %3640 = dma.done.wait [#allocation3], 256  }
  0x44   :  { %3641 = vsyncadd [#allocation3], 4294967040 }
  0x45   :  { %3642 = dma.done.wait [#allocation6], 384  }
  0x46   :  { %3643 = vsyncadd [#allocation6], 4294966912  ;;  %v96_v0 = vld [vmem:[#allocation5] sm:$0xff]  ;;  %v98_v1 = vld [vmem:[#allocation7] sm:$0xff]  ;;  %vm105_vm0 = vcmask 261120   ;;  %s3651_s30 = smov 120  }
  0x47   :  { %v97_v2 = vld [vmem:[#allocation5 + $0x8] sm:$0xff]  ;;  %v3798_v3 = vadd.f32 %v98_v1, %v96_v0  ;;  %v145_v17 = vld [vmem:[%s4322_s3] sm:$0xff]  ;;  %v146_v18 = vld [vmem:[%s4322_s3 + $0x8] sm:$0xff]  ;;  %vm267_vm1 = vcmask 64512   ;;  %s3652_s2 = smov 112   ;;  %s3653_s25 = smov 104  }
  0x48   :  { %v3800_v4 = vadd.f32 %v98_v1, %v97_v2  ;;  %v147_v19 = vld [vmem:[%s4322_s3 + $0x10] sm:$0xff]  ;;  %v3215_v20 = vpack.c.bf16 %v146_v18, %v145_v17  ;;  %v148_v21 = vld [vmem:[%s4322_s3 + $0x18] sm:$0xff]  ;;  %v2777_v30 = vld [vmem:[%s4330_s11] ss:$0 sm:$0xff]  ;;  %s3654_s0 = smov 96   ;;  %vm620_vm3 = vcmask 130048  }
  0x49   :  { %v106_v5 = vsel %vm105_vm0, %v3798_v3, 0.0  ;;  %v3219_v22 = vpack.c.bf16 %v148_v21, %v147_v19  ;;  %v2778_v32 = vld [vmem:[%s4331_s12] ss:$0 sm:$0xff]  ;;  %vm3855_vm2 = vmpackc.low %vm267_vm1, %vm267_vm1  ;;  %v3885_v17 = vld [vmem:[#allocation2 + $0x8] sm:$0xff]  ;;  %s3655_s24 = smov 64   ;;  %s3656_s21 = smov 16  }
  0x4a   :  { %107 = vadd.xlane.f32.xlu0 %v106_v5  ;;  %v109_v6 = vsel %vm105_vm0, %v3800_v4, 0.0  ;;  %3216 = vmatprep.subr.bf16.mxu1 %v3215_v20  ;;  %v2779_v39 = vld [vmem:[%s4323_s4] ss:$0 sm:$0xff]  ;;  %s4341_s27 = smov 24   ;;  %vm1085_vm4 = vcmask 195584   ;;  %vm1325_vm5 = vcmask 523264  }
  0x4b   :  { %3218 = vmatpush3.bf16.msra.mxu1 %v3215_v20  ;;  %v3887_v18 = vld [vmem:[#allocation2] sm:$0xff]  ;;  %s3658_s19 = smov [#allocation8]  }
  0x4c   :  { %3220 = vmatprep.subr.bf16.mxu1 %v3219_v22  ;;  %s2764_s17 = sshll.u32 %s3658_s19, 4  ;;  %s2765_s17 = int_to_ptr.vmem [resolvable:$true] %s2764_s17 }
  0x4d   :  { %s3618_s1 = scalar_lea.vmem %s2765_s17, 256  ;;  %p3623_p11 = scmp.lt.s32.totalorder %s2765_s17, %s2765_s17 }
  0x4e   :  { %110 = vadd.xlane.f32.xlu0 %v109_v6  ;;  %p3619_p10 = scmp.ne.s32.totalorder %s2765_s17, %s3618_s1  ;;  %p3624_p12 = scmp.lt.s32.totalorder %s3618_s1, %s3618_s1 }
  0x4f   :  { %3222 = vmatpush3.bf16.msra.mxu1 %v3219_v22 }
  0x50   :  { %p3625_p13 = por %p3624_p12, %p3623_p11 }
  0x52   :  { %p3626_p0 = pnand %p3625_p13, %p3619_p10 }
  0xd7   :  { %v108_v7 = vpop.xlane.xlu0 %107 }
  0xd8   :  { %v113_v8 = vmul.f32 0.03125, %v108_v7 }
  0xda   :  { %v115_v9 = vsub.f32 %v3798_v3, %v113_v8 }
  0xdb   :  { %v111_v10 = vpop.xlane.xlu0 %110 }
  0xdc   :  { %v114_v11 = vmul.f32 0.03125, %v111_v10  ;;  %v117_v12 = vmul.f32 %v115_v9, %v115_v9 }
  0xde   :  { %v116_v13 = vsub.f32 %v3800_v4, %v114_v11  ;;  %v119_v14 = vsel %vm105_vm0, %v117_v12, 0.0 }
  0xdf   :  { %120 = vadd.xlane.f32.xlu1 %v119_v14 }
  0xe0   :  { %v118_v15 = vmul.f32 %v116_v13, %v116_v13 }
  0xe2   :  { %v122_v16 = vsel %vm105_vm0, %v118_v15, 0.0 }
  0xe3   :  { %123 = vadd.xlane.f32.xlu1 %v122_v16 }
 0x16c   :  { %v121_v23 = vpop.xlane.xlu1 %120 }
 0x16d   :  { %v125_v24 = vmul.f32 0.03125, %v121_v23 }
 0x16f   :  { %v127_v25 = vadd.f32 1e-05, %v125_v24 }
 0x170   :  { %v124_v26 = vpop.xlane.xlu1 %123 }
 0x171   :  { %3468 = vrsqrt.f32 %v127_v25  ;;  %v126_v27 = vmul.f32 0.03125, %v124_v26 }
 0x173   :  { %v128_v28 = vadd.f32 1e-05, %v126_v27 }
 0x175   :  { %3470 = vrsqrt.f32 %v128_v28 }
 0x17b   :  { %v3469_v29 = vpop.eup %3468 }
 0x17c   :  { %v131_v31 = vmul.f32 %v3469_v29, %v115_v9 }
 0x17e   :  { %v137_v33 = vmul.f32 %v2777_v30, %v131_v31 }
 0x17f   :  { %v3471_v34 = vpop.eup %3470 }
 0x180   :  { %v132_v35 = vmul.f32 %v3471_v34, %v116_v13  ;;  %v143_v36 = vadd.f32 %v2778_v32, %v137_v33 }
 0x182   :  { %v138_v37 = vmul.f32 %v2777_v30, %v132_v35  ;;  %3007 = vmatprep.mubr.msk.f32.mxu1 %vm105_vm0, %v143_v36 }
 0x184   :  { %v144_v38 = vadd.f32 %v2778_v32, %v138_v37 }
 0x186   :  { %3008 = vmatmul.mubr.msk.f32.vlgmr.msra.gmra.mrb[0].mxu1 %vm105_vm0, %v144_v38 }
 0x259   :  { %v3009_v40 = vpop.f32.mrb[0].mxu1 }
 0x25a   :  { %v232_v41 = vadd.f32 %v3009_v40, %v2779_v39  ;;  %v226_v42 = vpop.f32.mrb[1].mxu1 }
 0x25b   :  { %v227_v43 = vadd.f32 %v2779_v39, %v226_v42 }
 0x25c   :  { %239 = vrot.lane.b32.xlu1 %v232_v41, %s3651_s30  ;;  %v256_v61 = vmul.f32 0.35355338, %v232_v41 }
 0x25d   :  { %237 = vrot.lane.b32.xlu0 %v227_v43, %s3651_s30  ;;  %v255_v44 = vmul.f32 0.35355338, %v227_v43  ;;  %v3835_v45 = vpack.i.bf16 %v232_v41, %v227_v43 }
 0x25f   :  { %3014 = vmatprep.mubr.msk.f32.mxu1 %vm267_vm1, %v255_v44 }
 0x260   :  { %245 = vrot.lane.b32.xlu1 %v232_v41, %s3652_s2 }
 0x261   :  { %249 = vrot.lane.b32.xlu0 %v227_v43, %s3653_s25 }
 0x264   :  { %243 = vrot.lane.b32.xlu1 %v227_v43, %s3652_s2 }
 0x265   :  { %3389 = vrot.lane.b32.xlu0 %v3835_v45, %s3654_s0 }
 0x268   :  { %251 = vrot.lane.b32.xlu1 %v232_v41, %s3653_s25 }
 0x2ce   :  { %v240_v46 = vpop.permute.xlu1 %239 }
 0x2cf   :  { %v238_v47 = vpop.permute.xlu0 %237  ;;  %v258_v9 = vmul.f32 0.35355338, %v240_v46 }
 0x2d0   :  { %v3844_v48 = vpack.i.bf16 %v240_v46, %v238_v47  ;;  %v257_v49 = vmul.f32 0.35355338, %v238_v47 }
 0x2d2   :  { %v246_v50 = vpop.permute.xlu1 %245  ;;  %3021 = vmatprep.mubr.msk.f32.mxu0 %vm267_vm1, %v257_v49  ;;  %3394 = vrot.lane.b32.xlu1 %v3844_v48, %s3654_s0 }
 0x2d3   :  { %v250_v51 = vpop.permute.xlu0 %249  ;;  %v260_v15 = vmul.f32 0.35355338, %v246_v50 }
 0x2d4   :  { %v261_v11 = vmul.f32 0.35355338, %v250_v51 }
 0x2d6   :  { %v244_v52 = vpop.permute.xlu1 %243 }
 0x2d7   :  { %v3849_v53 = vpack.i.bf16 %v246_v50, %v244_v52  ;;  %v3390_v54 = vpop.permute.xlu0 %3389  ;;  %v259_v62 = vmul.f32 0.35355338, %v244_v52 }
 0x2d8   :  { %v3392_v55 = vunpack.i.h.bf16 %v3390_v54  ;;  %v3391_v56 = vunpack.i.l.bf16 %v3390_v54 }
 0x2d9   :  { %3399 = vrot.lane.b32.xlu0 %v3849_v53, %s3654_s0 }
 0x2da   :  { %v3223_v58 = vpack.c.bf16 %v3392_v55, %v3391_v56  ;;  %v252_v59 = vpop.permute.xlu1 %251 }
 0x2db   :  { %v3859_v60 = vpack.i.bf16 %v252_v59, %v250_v51  ;;  %v262_v16 = vmul.f32 0.35355338, %v252_v59 }
 0x2dc   :  { %3225 = vmatprep.subr.msk.bf16.mxu1 %vm3855_vm2, %v3223_v58 }
 0x2dd   :  { %3404 = vrot.lane.b32.xlu1 %v3859_v60, %s3654_s0  ;;  %3228 = vmatpush3.bf16.xpose.msk.msra.mxu1 %vm3855_vm2, %v3223_v58 }
 0x2e4   :  { %3015 = vmatmul.mubr.msk.f32.vlgmr.msra.gmra.mrb[2].mxu1 %vm267_vm1, %v256_v61 }
 0x2e5   :  { %3028 = vmatprep.mubr.msk.f32.mxu1 %vm267_vm1, %v259_v62 }
 0x344   :  { %v3395_v63 = vpop.permute.xlu1 %3394 }
 0x345   :  { %v3397_v0 = vunpack.i.h.bf16 %v3395_v63  ;;  %v3396_v1 = vunpack.i.l.bf16 %v3395_v63 }
 0x347   :  { %v3229_v2 = vpack.c.bf16 %v3397_v0, %v3396_v1 }
 0x349   :  { %3231 = vmatprep.subr.msk.bf16.mxu0 %vm3855_vm2, %v3229_v2 }
 0x34a   :  { %3234 = vmatpush3.bf16.xpose.msk.msra.mxu0 %vm3855_vm2, %v3229_v2 }
 0x34b   :  { %v3400_v5 = vpop.permute.xlu0 %3399 }
 0x34c   :  { %v3402_v6 = vunpack.i.h.bf16 %v3400_v5  ;;  %v3401_v7 = vunpack.i.l.bf16 %v3400_v5 }
 0x34e   :  { %v3235_v8 = vpack.c.bf16 %v3402_v6, %v3401_v7 }
 0x34f   :  { %v3405_v10 = vpop.permute.xlu1 %3404 }
 0x350   :  { %v3407_v12 = vunpack.i.h.bf16 %v3405_v10  ;;  %v3406_v13 = vunpack.i.l.bf16 %v3405_v10  ;;  %3237 = vmatprep.subr.msk.bf16.mxu1 %vm3855_vm2, %v3235_v8 }
 0x351   :  { %3022 = vmatmul.mubr.msk.f32.vlgmr.msra.gmra.mrb[0].mxu0 %vm267_vm1, %v258_v9  ;;  %3240 = vmatpush3.bf16.xpose.msk.msra.mxu1 %vm3855_vm2, %v3235_v8 }
 0x352   :  { %v3241_v14 = vpack.c.bf16 %v3407_v12, %v3406_v13  ;;  %3035 = vmatprep.mubr.msk.f32.mxu0 %vm267_vm1, %v261_v11 }
 0x354   :  { %3243 = vmatprep.subr.msk.bf16.mxu0 %vm3855_vm2, %v3241_v14 }
 0x355   :  { %3246 = vmatpush3.bf16.xpose.msk.msra.mxu0 %vm3855_vm2, %v3241_v14 }
 0x358   :  { %3029 = vmatmul.mubr.msk.f32.vlgmr.msra.gmra.mrb[4].mxu1 %vm267_vm1, %v260_v15 }
 0x35c   :  { %3036 = vmatmul.mubr.msk.f32.vlgmr.msra.gmra.mrb[2].mxu0 %vm267_vm1, %v262_v16 }
 0x3b7   :  { %v3016_v19 = vpop.f32.mrb[2].mxu1 }
 0x3b8   :  { %v350_v20 = vadd.f32 %v3016_v19, %v3885_v17  ;;  %v344_v21 = vpop.f32.mrb[3].mxu1 }
 0x3b9   :  { %v345_v22 = vadd.f32 %v344_v21, %v3887_v18 }
 0x3ba   :  { %v624_v23 = vsel %vm620_vm3, %v350_v20, -inf }
 0x3bb   :  { %625 = vmax.xlane.f32.xlu1 %v624_v23  ;;  %v621_v24 = vsel %vm620_vm3, %v345_v22, -inf }
 0x3bc   :  { %622 = vmax.xlane.f32.xlu0 %v621_v24 }
 0x424   :  { %v3023_v25 = vpop.f32.mrb[0].mxu0 }
 0x425   :  { %v439_v26 = vadd.f32 %v3023_v25, %v3885_v17  ;;  %v433_v27 = vpop.f32.mrb[1].mxu0 }
 0x426   :  { %v434_v28 = vadd.f32 %v433_v27, %v3887_v18 }
 0x427   :  { %v630_v29 = vsel %vm620_vm3, %v439_v26, -inf }
 0x428   :  { %631 = vmax.xlane.f32.xlu0 %v630_v29  ;;  %v627_v31 = vsel %vm620_vm3, %v434_v28, -inf }
 0x42b   :  { %v3030_v30 = vpop.f32.mrb[4].mxu1 }
 0x42c   :  { %v528_v32 = vadd.f32 %v3030_v30, %v3885_v17  ;;  %v522_v33 = vpop.f32.mrb[5].mxu1  ;;  %628 = vmax.xlane.f32.xlu0 %v627_v31 }
 0x42d   :  { %v523_v34 = vadd.f32 %v522_v33, %v3887_v18 }
 0x42e   :  { %v636_v35 = vsel %vm620_vm3, %v528_v32, -inf }
 0x42f   :  { %v3037_v36 = vpop.f32.mrb[2].mxu0  ;;  %637 = vmax.xlane.f32.xlu1 %v636_v35  ;;  %v633_v37 = vsel %vm620_vm3, %v523_v34, -inf }
 0x430   :  { %v617_v38 = vadd.f32 %v3037_v36, %v3885_v17  ;;  %v611_v39 = vpop.f32.mrb[3].mxu0  ;;  %634 = vmax.xlane.f32.xlu0 %v633_v37 }
 0x431   :  { %v612_v40 = vadd.f32 %v611_v39, %v3887_v18 }
 0x432   :  { %v642_v41 = vsel %vm620_vm3, %v617_v38, -inf }
 0x433   :  { %643 = vmax.xlane.f32.xlu1 %v642_v41  ;;  %v639_v42 = vsel %vm620_vm3, %v612_v40, -inf }
 0x434   :  { %640 = vmax.xlane.f32.xlu0 %v639_v42 }
 0x448   :  { %v626_v43 = vpop.xlane.xlu1 %625 }
 0x449   :  { %v646_v44 = vsub.f32 %v350_v20, %v626_v43  ;;  %v623_v46 = vpop.xlane.xlu0 %622 }
 0x44a   :  { %v645_v47 = vsub.f32 %v345_v22, %v623_v46 }
 0x44b   :  { %v655_v49 = vmul.f32 1.442695, %v646_v44 }
 0x44c   :  { %v653_v50 = vmul.f32 1.442695, %v645_v47 }
 0x44d   :  { %3472 = vpow2.f32 %v655_v49 }
 0x44e   :  { %3474 = vpow2.f32 %v653_v50 }
 0x457   :  { %v3905_v51 = vpop.eup %3472 }
 0x458   :  { %v3475_v52 = vpop.eup %3474  ;;  %v672_v54 = vsel %vm620_vm3, %v3905_v51, 0.0 }
 0x459   :  { %673 = vadd.xlane.f32.xlu1 %v672_v54  ;;  %v669_v55 = vsel %vm620_vm3, %v3475_v52, 0.0 }
 0x45a   :  { %670 = vadd.xlane.f32.xlu0 %v669_v55 }
 0x4b5   :  { %v632_v56 = vpop.xlane.xlu0 %631 }
 0x4b6   :  { %v648_v58 = vsub.f32 %v439_v26, %v632_v56 }
 0x4b8   :  { %v659_v59 = vmul.f32 1.442695, %v648_v58 }
 0x4b9   :  { %v629_v61 = vpop.xlane.xlu0 %628 }
 0x4ba   :  { %3476 = vpow2.f32 %v659_v59  ;;  %v647_v62 = vsub.f32 %v434_v28, %v629_v61 }
 0x4bc   :  { %v657_v63 = vmul.f32 1.442695, %v647_v62  ;;  %v638_v0 = vpop.xlane.xlu1 %637 }
 0x4bd   :  { %v650_v1 = vsub.f32 %v528_v32, %v638_v0  ;;  %v635_v2 = vpop.xlane.xlu0 %634 }
 0x4be   :  { %3478 = vpow2.f32 %v657_v63  ;;  %v649_v5 = vsub.f32 %v523_v34, %v635_v2 }
 0x4bf   :  { %v663_v6 = vmul.f32 1.442695, %v650_v1 }
 0x4c0   :  { %v661_v7 = vmul.f32 1.442695, %v649_v5  ;;  %v644_v8 = vpop.xlane.xlu1 %643 }
 0x4c1   :  { %3480 = vpow2.f32 %v663_v6  ;;  %v652_v9 = vsub.f32 %v617_v38, %v644_v8  ;;  %v641_v10 = vpop.xlane.xlu0 %640  ;;  %v1089_v8 = vld [vmem:[%s4324_s5 + $0x8] sm:$0xff] }
 0x4c2   :  { %3482 = vpow2.f32 %v661_v7  ;;  %v651_v11 = vsub.f32 %v612_v40, %v641_v10  ;;  %v1088_v7 = vld [vmem:[%s4324_s5] sm:$0xff]  ;;  %v1090_v10 = vld [vmem:[%s4324_s5 + $0x10] sm:$0xff] }
 0x4c3   :  { %v667_v12 = vmul.f32 1.442695, %v652_v9  ;;  %v3263_v9 = vpack.c.bf16 %v1089_v8, %v1088_v7 }
 0x4c4   :  { %v3910_v13 = vpop.eup %3476  ;;  %v665_v14 = vmul.f32 1.442695, %v651_v11  ;;  %v1091_v11 = vld [vmem:[%s4324_s5 + $0x18] sm:$0xff] }
 0x4c5   :  { %3484 = vpow2.f32 %v667_v12  ;;  %v678_v15 = vsel %vm620_vm3, %v3910_v13, 0.0  ;;  %v3267_v12 = vpack.c.bf16 %v1091_v11, %v1090_v10 }
 0x4c6   :  { %3486 = vpow2.f32 %v665_v14  ;;  %679 = vadd.xlane.f32.xlu1 %v678_v15 }
 0x4c8   :  { %v3914_v16 = vpop.eup %3478 }
 0x4c9   :  { %v675_v19 = vsel %vm620_vm3, %v3914_v16, 0.0 }
 0x4ca   :  { %676 = vadd.xlane.f32.xlu0 %v675_v19 }
 0x4cb   :  { %v3918_v20 = vpop.eup %3480 }
 0x4cc   :  { %v3483_v21 = vpop.eup %3482  ;;  %v684_v22 = vsel %vm620_vm3, %v3918_v20, 0.0 }
 0x4cd   :  { %685 = vadd.xlane.f32.xlu1 %v684_v22  ;;  %v681_v23 = vsel %vm620_vm3, %v3483_v21, 0.0 }
 0x4ce   :  { %682 = vadd.xlane.f32.xlu0 %v681_v23 }
 0x4cf   :  { %v3923_v24 = vpop.eup %3484 }
 0x4d0   :  { %v3925_v25 = vpop.eup %3486  ;;  %v690_v26 = vsel %vm620_vm3, %v3923_v24, 0.0 }
 0x4d1   :  { %691 = vadd.xlane.f32.xlu1 %v690_v26  ;;  %v687_v27 = vsel %vm620_vm3, %v3925_v25, 0.0 }
 0x4d2   :  { %688 = vadd.xlane.f32.xlu0 %v687_v27 }
 0x4e2   :  { %3414 = vrot.lane.b32.xlu1 %v3844_v48, %s3655_s24 }
 0x4e6   :  { %3419 = vrot.lane.b32.xlu1 %v3849_v53, %s3655_s24  ;;  %v674_v31 = vpop.xlane.xlu1 %673 }
 0x4e7   :  { %v671_v28 = vpop.xlane.xlu0 %670 }
 0x4e8   :  { %3488 = vrcp.f32 %v671_v28  ;;  %3409 = vrot.lane.b32.xlu0 %v3835_v45, %s3655_s24 }
 0x4ea   :  { %3424 = vrot.lane.b32.xlu1 %v3859_v60, %s3655_s24 }
 0x4f2   :  { %v3489_v29 = vpop.eup %3488 }
 0x4f3   :  { %v694_v30 = vmul.f32 %v3489_v29, %v3475_v52 }
 0x4f5   :  { %3042 = vmatprep.mubr.msk.f32.mxu1 %vm620_vm3, %v694_v30 }
 0x553   :  { %v680_v32 = vpop.xlane.xlu1 %679 }
 0x557   :  { %v677_v33 = vpop.xlane.xlu0 %676 }
 0x55a   :  { %v686_v34 = vpop.xlane.xlu1 %685 }
 0x55b   :  { %v683_v48 = vpop.xlane.xlu0 %682 }
 0x55c   :  { %3490 = vrcp.f32 %v683_v48  ;;  %v2806_v48 = vld [vmem:[%s4325_s6] ss:$0 sm:$0xff] }
 0x55d   :  { %3492 = vrcp.f32 %v674_v31 }
 0x55e   :  { %3494 = vrcp.f32 %v677_v33  ;;  %v692_v53 = vpop.xlane.xlu1 %691 }
 0x55f   :  { %v689_v35 = vpop.xlane.xlu0 %688  ;;  %3496 = vrcp.f32 %v686_v34 }
 0x560   :  { %3498 = vrcp.f32 %v680_v32 }
 0x561   :  { %3500 = vrcp.f32 %v689_v35 }
 0x562   :  { %v3415_v45 = vpop.permute.xlu1 %3414  ;;  %3502 = vrcp.f32 %v692_v53 }
 0x563   :  { %v3410_v36 = vpop.permute.xlu0 %3409  ;;  %v3417_v60 = vunpack.i.h.bf16 %v3415_v45  ;;  %v3416_v37 = vunpack.i.l.bf16 %v3415_v45 }
 0x564   :  { %v3412_v38 = vunpack.i.h.bf16 %v3410_v36  ;;  %v3411_v39 = vunpack.i.l.bf16 %v3410_v36 }
 0x565   :  { %v3251_v50 = vpack.c.bf16 %v3417_v60, %v3416_v37 }
 0x566   :  { %v3491_v40 = vpop.eup %3490  ;;  %v3247_v41 = vpack.c.bf16 %v3412_v38, %v3411_v39  ;;  %v3420_v42 = vpop.permute.xlu1 %3419 }
 0x567   :  { %v3493_v43 = vpop.eup %3492  ;;  %v3422_v44 = vunpack.i.h.bf16 %v3420_v42  ;;  %v3421_v46 = vunpack.i.l.bf16 %v3420_v42  ;;  %v702_v47 = vmul.f32 %v3491_v40, %v3483_v21 }
 0x568   :  { %v3495_v49 = vpop.eup %3494  ;;  %3248 = vmatprep.subr.bf16.mxu1 %v3247_v41  ;;  %v696_v55 = vmul.f32 %v3493_v43, %v3905_v51 }
 0x569   :  { %v3255_v52 = vpack.c.bf16 %v3422_v44, %v3421_v46  ;;  %3250 = vmatpush3.bf16.msra.mxu1 %v3247_v41  ;;  %3056 = vmatprep.mubr.msk.f32.mxu0 %vm620_vm3, %v702_v47  ;;  %v3497_v54 = vpop.eup %3496  ;;  %v698_v62 = vmul.f32 %v3495_v49, %v3914_v16 }
 0x56a   :  { %v3425_v56 = vpop.permute.xlu1 %3424  ;;  %3252 = vmatprep.subr.bf16.mxu1 %v3251_v50  ;;  %v3499_v58 = vpop.eup %3498  ;;  %v704_v0 = vmul.f32 %v3497_v54, %v3918_v20 }
 0x56b   :  { %v3427_v59 = vunpack.i.h.bf16 %v3425_v56  ;;  %v3426_v61 = vunpack.i.l.bf16 %v3425_v56  ;;  %3256 = vmatprep.subr.bf16.mxu0 %v3255_v52  ;;  %v3501_v63 = vpop.eup %3500  ;;  %v700_v51 = vmul.f32 %v3499_v58, %v3910_v13  ;;  %v1223_v56 = vld [vmem:[%s4326_s7 + $0x18] sm:$0xff] }
 0x56c   :  { %3043 = vmatmul.mubr.msk.f32.vlgmr.msra.gmra.mrb[6].mxu1 %vm620_vm3, %v696_v55  ;;  %3258 = vmatpush3.bf16.msra.mxu0 %v3255_v52  ;;  %v3503_v2 = vpop.eup %3502  ;;  %v706_v5 = vmul.f32 %v3501_v63, %v3925_v25  ;;  %v1221_v52 = vld [vmem:[%s4326_s7 + $0x8] sm:$0xff]  ;;  %v1222_v55 = vld [vmem:[%s4326_s7 + $0x10] sm:$0xff] }
 0x56d   :  { %v3259_v1 = vpack.c.bf16 %v3427_v59, %v3426_v61  ;;  %3254 = vmatpush3.bf16.msra.mxu1 %v3251_v50  ;;  %3049 = vmatprep.mubr.msk.f32.mxu1 %vm620_vm3, %v698_v62  ;;  %v708_v6 = vmul.f32 %v3503_v2, %v3923_v24  ;;  %v1220_v50 = vld [vmem:[%s4326_s7] sm:$0xff]  ;;  %v3275_v58 = vpack.c.bf16 %v1223_v56, %v1222_v55  ;;  %v1313_v61 = vld [vmem:[%s4328_s9 + $0x8] sm:$0xff]  ;;  %v1314_v62 = vld [vmem:[%s4328_s9 + $0x10] sm:$0xff] }
 0x56e   :  { %3264 = vmatprep.subr.bf16.mxu0 %v3263_v9  ;;  %v3271_v54 = vpack.c.bf16 %v1221_v52, %v1220_v50  ;;  %v1312_v59 = vld [vmem:[%s4328_s9] sm:$0xff]  ;;  %v1317_v2 = vld [vmem:[%s4328_s9 + $0x28] sm:$0xff]  ;;  %v2822_v55 = vld [vmem:[%s4322_s3 + $0x38] sm:$0xff] }
 0x56f   :  { %3057 = vmatmul.mubr.msk.f32.vlgmr.msra.gmra.mrb[4].mxu0 %vm620_vm3, %v704_v0  ;;  %3260 = vmatprep.subr.bf16.mxu1 %v3259_v1  ;;  %v3279_v63 = vpack.c.bf16 %v1313_v61, %v1312_v59  ;;  %v1315_v0 = vld [vmem:[%s4328_s9 + $0x18] sm:$0xff]  ;;  %v2820_v50 = vld [vmem:[%s4322_s3 + $0x28] sm:$0xff] }
 0x570   :  { %3050 = vmatmul.mubr.msk.f32.vlgmr.msra.gmra.mrb[8].mxu1 %vm620_vm3, %v700_v51  ;;  %3266 = vmatpush3.bf16.msra.mxu0 %v3263_v9  ;;  %v1316_v51 = vld [vmem:[%s4328_s9 + $0x20] sm:$0xff] }
 0x571   :  { %3262 = vmatpush3.bf16.msra.mxu1 %v3259_v1  ;;  %3063 = vmatprep.mubr.msk.f32.mxu1 %vm620_vm3, %v706_v5  ;;  %v3283_v1 = vpack.c.bf16 %v1315_v0, %v1314_v62  ;;  %v3287_v5 = vpack.c.bf16 %v1317_v2, %v1316_v51  ;;  %v2817_v51 = vld [vmem:[%s4330_s11 + $0x1] ss:$0 sm:$0xff] }
 0x572   :  { %3268 = vmatprep.subr.bf16.mxu0 %v3267_v12  ;;  %3272 = vmatprep.subr.bf16.mxu1 %v3271_v54 }
 0x574   :  { %3064 = vmatmul.mubr.msk.f32.vlgmr.msra.gmra.mrb[10].mxu1 %vm620_vm3, %v708_v6  ;;  %3270 = vmatpush3.bf16.msra.mxu0 %v3267_v12 }
 0x575   :  { %3274 = vmatpush3.bf16.msra.mxu1 %v3271_v54  ;;  %3280 = vmatprep.subr.bf16.mxu0 %v3279_v63  ;;  %v2821_v54 = vld [vmem:[%s4322_s3 + $0x30] sm:$0xff] }
 0x576   :  { %3276 = vmatprep.subr.bf16.mxu1 %v3275_v58  ;;  %v3299_v56 = vpack.c.bf16 %v2822_v55, %v2821_v54 }
 0x579   :  { %3278 = vmatpush3.bf16.msra.mxu1 %v3275_v58 }
 0x63f   :  { %v3044_v13 = vpop.f32.mrb[6].mxu1 }
 0x640   :  { %v787_v14 = vpop.f32.mrb[7].mxu1 }
 0x642   :  { %v3058_v15 = vpop.f32.mrb[4].mxu0 }
 0x643   :  { %v3051_v16 = vpop.f32.mrb[8].mxu1  ;;  %v961_v19 = vpop.f32.mrb[5].mxu0 }
 0x644   :  { %1061 = vrot.lane.b32.xlu1 %v3051_v16, %s3649_s23  ;;  %v874_v20 = vpop.f32.mrb[9].mxu1 }
 0x645   :  { %1059 = vrot.lane.b32.xlu0 %v874_v20, %s3649_s23 }
 0x647   :  { %v3065_v21 = vpop.f32.mrb[10].mxu1 }
 0x648   :  { %1069 = vrot.lane.b32.xlu1 %v3058_v15, %s3656_s21  ;;  %v1048_v22 = vpop.f32.mrb[11].mxu1  ;;  %v2810_v15 = vld [vmem:[%s4333_s14] ss:$0 sm:$0xff] }
 0x649   :  { %1067 = vrot.lane.b32.xlu0 %v961_v19, %s3656_s21 }
 0x64c   :  { %1077 = vrot.lane.b32.xlu1 %v3065_v21, %s4341_s27 }
 0x64d   :  { %1075 = vrot.lane.b32.xlu0 %v1048_v22, %s4341_s27 }
 0x6b6   :  { %v1062_v23 = vpop.permute.xlu1 %1061 }
 0x6b7   :  { %v1060_v24 = vpop.permute.xlu0 %1059  ;;  %v1082_v29 = vsel %vm267_vm1, %v3044_v13, %v1062_v23  ;;  %v2809_v13 = vld [vmem:[%s4332_s13] ss:$0 sm:$0xff] }
 0x6b8   :  { %v1081_v27 = vsel %vm267_vm1, %v787_v14, %v1060_v24  ;;  %v1318_v24 = vld [vmem:[%s4328_s9 + $0x30] sm:$0xff] }
 0x6ba   :  { %v1070_v25 = vpop.permute.xlu1 %1069 }
 0x6bb   :  { %v1068_v26 = vpop.permute.xlu0 %1067  ;;  %v1084_v32 = vsel %vm620_vm3, %v1082_v29, %v1070_v25  ;;  %v1319_v25 = vld [vmem:[%s4328_s9 + $0x38] sm:$0xff] }
 0x6bc   :  { %v1083_v30 = vsel %vm620_vm3, %v1081_v27, %v1068_v26  ;;  %v3291_v26 = vpack.c.bf16 %v1319_v25, %v1318_v24  ;;  %v2811_v27 = vld [vmem:[%s4327_s8] ss:$0 sm:$0xff] }
 0x6be   :  { %v1078_v28 = vpop.permute.xlu1 %1077 }
 0x6bf   :  { %v1076_v31 = vpop.permute.xlu0 %1075  ;;  %v1087_v34 = vsel %vm1085_vm4, %v1084_v32, %v1078_v28 }
 0x6c0   :  { %v1086_v33 = vsel %vm1085_vm4, %v1083_v30, %v1076_v31 }
 0x6c1   :  { %3074 = vmatprep.mubr.msk.f32.mxu0 %vm105_vm0, %v1086_v33 }
 0x6c2   :  { %3075 = vmatmul.mubr.msk.f32.vlgmr.msra.gmra.mrb[6].mxu0 %vm105_vm0, %v1087_v34  ;;  %v2814_v34 = vld [vmem:[%s4329_s10] ss:$0 sm:$0xff] }
 0x6c3   :  { %3282 = vmatpush3.bf16.msra.mxu0 %v3279_v63 }
 0x6c4   :  { %3284 = vmatprep.subr.bf16.mxu0 %v3283_v1 }
 0x6c7   :  { %3286 = vmatpush3.bf16.msra.mxu0 %v3283_v1 }
 0x6c8   :  { %3288 = vmatprep.subr.bf16.mxu0 %v3287_v5 }
 0x6cb   :  { %3290 = vmatpush3.bf16.msra.mxu0 %v3287_v5 }
 0x6cc   :  { %3292 = vmatprep.subr.bf16.mxu0 %v3291_v26 }
 0x6cf   :  { %3294 = vmatpush3.bf16.msra.mxu0 %v3291_v26 }
 0x795   :  { %v3076_v53 = vpop.f32.mrb[6].mxu0 }
 0x796   :  { %v1175_v35 = vadd.f32 %v3076_v53, %v2806_v48  ;;  %v1169_v45 = vpop.f32.mrb[7].mxu0 }
 0x797   :  { %v1170_v36 = vadd.f32 %v2806_v48, %v1169_v45 }
 0x798   :  { %v3983_v60 = vadd.f32 %v1175_v35, %v3800_v4 }
 0x799   :  { %v3986_v37 = vadd.f32 %v1170_v36, %v3798_v3 }
 0x79a   :  { %v1185_v38 = vsel %vm105_vm0, %v3983_v60, 0.0 }
 0x79b   :  { %1186 = vadd.xlane.f32.xlu1 %v1185_v38  ;;  %v1182_v39 = vsel %vm105_vm0, %v3986_v37, 0.0 }
 0x79c   :  { %1183 = vadd.xlane.f32.xlu0 %v1182_v39 }
 0x828   :  { %v1187_v40 = vpop.xlane.xlu1 %1186 }
 0x829   :  { %v1189_v41 = vmul.f32 0.03125, %v1187_v40  ;;  %v1184_v42 = vpop.xlane.xlu0 %1183 }
 0x82a   :  { %v1188_v43 = vmul.f32 0.03125, %v1184_v42 }
 0x82b   :  { %v1191_v44 = vsub.f32 %v3983_v60, %v1189_v41 }
 0x82c   :  { %v1190_v4 = vsub.f32 %v3986_v37, %v1188_v43 }
 0x82d   :  { %v1193_v47 = vmul.f32 %v1191_v44, %v1191_v44 }
 0x82e   :  { %v1192_v46 = vmul.f32 %v1190_v4, %v1190_v4 }
 0x82f   :  { %v1197_v49 = vsel %vm105_vm0, %v1193_v47, 0.0 }
 0x830   :  { %v1194_v3 = vsel %vm105_vm0, %v1192_v46, 0.0 }
 0x831   :  { %1195 = vadd.xlane.f32.xlu0 %v1194_v3 }
 0x835   :  { %1198 = vadd.xlane.f32.xlu0 %v1197_v49  ;;  %v2819_v49 = vld [vmem:[%s4322_s3 + $0x20] sm:$0xff] }
 0x836   :  { %v3295_v52 = vpack.c.bf16 %v2820_v50, %v2819_v49 }
 0x838   :  { %3296 = vmatprep.subr.bf16.mxu1 %v3295_v52 }
 0x8be   :  { %v1196_v6 = vpop.xlane.xlu0 %1195 }
 0x8bf   :  { %v1200_v7 = vmul.f32 0.03125, %v1196_v6 }
 0x8c1   :  { %v1202_v8 = vadd.f32 1e-05, %v1200_v7  ;;  %v2818_v7 = vld [vmem:[%s4331_s12 + $0x1] ss:$0 sm:$0xff] }
 0x8c2   :  { %v1199_v9 = vpop.xlane.xlu0 %1198 }
 0x8c3   :  { %3504 = vrsqrt.f32 %v1202_v8  ;;  %v1201_v10 = vmul.f32 0.03125, %v1199_v9 }
 0x8c5   :  { %v1203_v11 = vadd.f32 1e-05, %v1201_v10 }
 0x8c7   :  { %3506 = vrsqrt.f32 %v1203_v11 }
 0x8cd   :  { %v3505_v12 = vpop.eup %3504 }
 0x8ce   :  { %v1206_v14 = vmul.f32 %v3505_v12, %v1190_v4  ;;  %v2823_v12 = vld [vmem:[%s4323_s4 + $0x1] ss:$0 sm:$0xff] }
 0x8d0   :  { %v1212_v16 = vmul.f32 %v2809_v13, %v1206_v14 }
 0x8d1   :  { %v3507_v19 = vpop.eup %3506 }
 0x8d2   :  { %v1207_v20 = vmul.f32 %v3507_v19, %v1191_v44  ;;  %v1218_v21 = vadd.f32 %v2810_v15, %v1212_v16 }
 0x8d4   :  { %v1213_v22 = vmul.f32 %v2809_v13, %v1207_v20  ;;  %3085 = vmatprep.mubr.msk.f32.mxu1 %vm105_vm0, %v1218_v21 }
 0x8d6   :  { %v1219_v23 = vadd.f32 %v2810_v15, %v1213_v22 }
 0x8d8   :  { %3086 = vmatmul.mubr.msk.f32.vlgmr.msra.gmra.mrb[12].mxu1 %vm105_vm0, %v1219_v23 }
 0x8d9   :  { %3298 = vmatpush3.bf16.msra.mxu1 %v3295_v52 }
 0x8da   :  { %3300 = vmatprep.subr.bf16.mxu1 %v3299_v56 }
 0x8dd   :  { %3302 = vmatpush3.bf16.msra.mxu1 %v3299_v56 }
 0x9ab   :  { %v3087_v28 = vpop.f32.mrb[12].mxu1 }
 0x9ac   :  { %v1307_v29 = vadd.f32 %v3087_v28, %v2811_v27  ;;  %v1301_v30 = vpop.f32.mrb[13].mxu1 }
 0x9ad   :  { %v1302_v31 = vadd.f32 %v2811_v27, %v1301_v30 }
 0x9ae   :  { %v1311_v33 = vmax.f32 %v1307_v29, 0.0 }
 0x9af   :  { %v1310_v32 = vmax.f32 %v1302_v31, 0.0 }
 0x9b1   :  { %3104 = vmatprep.mubr.msk.f32.mxu0 %vm1325_vm5, %v1310_v32 }
 0x9b2   :  { %3105 = vmatmul.mubr.msk.f32.vlgmr.msra.gmra.mrb[8].mxu0 %vm1325_vm5, %v1311_v33 }
 0xa85   :  { %v3106_v48 = vpop.f32.mrb[8].mxu0 }
 0xa86   :  { %v1404_v53 = vadd.f32 %v3106_v48, %v2814_v34  ;;  %v1398_v35 = vpop.f32.mrb[9].mxu0 }
 0xa87   :  { %v1399_v45 = vadd.f32 %v2814_v34, %v1398_v35 }
 0xa88   :  { %v4049_v36 = vadd.f32 %v1404_v53, %v3983_v60 }
 0xa89   :  { %v4052_v38 = vadd.f32 %v1399_v45, %v3986_v37 }
 0xa8a   :  { %v1414_v39 = vsel %vm105_vm0, %v4049_v36, 0.0 }
 0xa8b   :  { %1415 = vadd.xlane.f32.xlu1 %v1414_v39  ;;  %v1411_v40 = vsel %vm105_vm0, %v4052_v38, 0.0 }
 0xa8c   :  { %1412 = vadd.xlane.f32.xlu0 %v1411_v40 }
 0xb18   :  { %v1416_v41 = vpop.xlane.xlu1 %1415 }
 0xb19   :  { %v1418_v42 = vmul.f32 0.03125, %v1416_v41  ;;  %v1413_v43 = vpop.xlane.xlu0 %1412 }
 0xb1a   :  { %v1417_v44 = vmul.f32 0.03125, %v1413_v43 }
 0xb1b   :  { %v1420_v4 = vsub.f32 %v4049_v36, %v1418_v42 }
 0xb1c   :  { %v1419_v60 = vsub.f32 %v4052_v38, %v1417_v44 }
 0xb1d   :  { %v1422_v46 = vmul.f32 %v1420_v4, %v1420_v4 }
 0xb1e   :  { %v1421_v3 = vmul.f32 %v1419_v60, %v1419_v60 }
 0xb1f   :  { %v1426_v37 = vsel %vm105_vm0, %v1422_v46, 0.0 }
 0xb20   :  { %1427 = vadd.xlane.f32.xlu1 %v1426_v37  ;;  %v1423_v47 = vsel %vm105_vm0, %v1421_v3, 0.0 }
 0xb21   :  { %1424 = vadd.xlane.f32.xlu0 %v1423_v47 }
 0xbad   :  { %v1428_v58 = vpop.xlane.xlu1 %1427 }
 0xbae   :  { %v1430_v59 = vmul.f32 0.03125, %v1428_v58  ;;  %v1425_v61 = vpop.xlane.xlu0 %1424 }
 0xbaf   :  { %v1429_v62 = vmul.f32 0.03125, %v1425_v61 }
 0xbb0   :  { %v1432_v63 = vadd.f32 1e-05, %v1430_v59 }
 0xbb1   :  { %v1431_v0 = vadd.f32 1e-05, %v1429_v62 }
 0xbb2   :  { %3508 = vrsqrt.f32 %v1432_v63 }
 0xbb3   :  { %3510 = vrsqrt.f32 %v1431_v0 }
 0xbbc   :  { %v3509_v1 = vpop.eup %3508 }
 0xbbd   :  { %v3511_v2 = vpop.eup %3510  ;;  %v1436_v5 = vmul.f32 %v3509_v1, %v1420_v4 }
 0xbbe   :  { %v1435_v6 = vmul.f32 %v3511_v2, %v1419_v60 }
 0xbbf   :  { %v1442_v8 = vmul.f32 %v2817_v51, %v1436_v5 }
 0xbc0   :  { %v1441_v9 = vmul.f32 %v2817_v51, %v1435_v6 }
 0xbc1   :  { %v1448_v11 = vadd.f32 %v2818_v7, %v1442_v8 }
 0xbc2   :  { %v1447_v10 = vadd.f32 %v2818_v7, %v1441_v9 }
 0xbc4   :  { %3115 = vmatprep.mubr.msk.f32.mxu1 %vm105_vm0, %v1447_v10 }
 0xbc5   :  { %3116 = vmatmul.mubr.msk.f32.vlgmr.msra.gmra.mrb[14].mxu1 %vm105_vm0, %v1448_v11 }
 0xc98   :  { %v3117_v13 = vpop.f32.mrb[14].mxu1 }
 0xc99   :  { %v1537_v14 = vadd.f32 %v3117_v13, %v2823_v12  ;;  %v1531_v15 = vpop.f32.mrb[15].mxu1 }
 0xc9a   :  { %v1532_v16 = vadd.f32 %v2823_v12, %v1531_v15 }
 0xc9b   :  { %1544 = vrot.lane.b32.xlu1 %v1537_v14, %s3651_s30  ;;  %v1561_v48 = vmul.f32 0.35355338, %v1537_v14 }
 0xc9c   :  { %1542 = vrot.lane.b32.xlu0 %v1532_v16, %s3651_s30  ;;  %v1560_v19 = vmul.f32 0.35355338, %v1532_v16  ;;  %v4087_v20 = vpack.i.bf16 %v1537_v14, %v1532_v16 }
 0xc9e   :  { %3122 = vmatprep.mubr.msk.f32.mxu1 %vm267_vm1, %v1560_v19 }
 0xc9f   :  { %1550 = vrot.lane.b32.xlu1 %v1537_v14, %s3652_s2 }
 0xca0   :  { %1554 = vrot.lane.b32.xlu0 %v1532_v16, %s3653_s25 }
 0xca3   :  { %1548 = vrot.lane.b32.xlu1 %v1532_v16, %s3652_s2 }
 0xca4   :  { %3429 = vrot.lane.b32.xlu0 %v4087_v20, %s3654_s0 }
 0xca7   :  { %1556 = vrot.lane.b32.xlu1 %v1537_v14, %s3653_s25 }
 0xd0d   :  { %v1545_v21 = vpop.permute.xlu1 %1544 }
 0xd0e   :  { %v1543_v22 = vpop.permute.xlu0 %1542  ;;  %v1563_v4 = vmul.f32 0.35355338, %v1545_v21 }
 0xd0f   :  { %v1562_v23 = vmul.f32 0.35355338, %v1543_v22  ;;  %v4096_v24 = vpack.i.bf16 %v1545_v21, %v1543_v22 }
 0xd11   :  { %v1551_v25 = vpop.permute.xlu1 %1550  ;;  %3129 = vmatprep.mubr.msk.f32.mxu0 %vm267_vm1, %v1562_v23  ;;  %3434 = vrot.lane.b32.xlu1 %v4096_v24, %s3654_s0 }
 0xd12   :  { %v1555_v26 = vpop.permute.xlu0 %1554  ;;  %v1565_v49 = vmul.f32 0.35355338, %v1551_v25 }
 0xd13   :  { %v1566_v46 = vmul.f32 0.35355338, %v1555_v26 }
 0xd15   :  { %v1549_v27 = vpop.permute.xlu1 %1548 }
 0xd16   :  { %v4101_v28 = vpack.i.bf16 %v1551_v25, %v1549_v27  ;;  %v3430_v29 = vpop.permute.xlu0 %3429  ;;  %v1564_v53 = vmul.f32 0.35355338, %v1549_v27 }
 0xd17   :  { %v3432_v30 = vunpack.i.h.bf16 %v3430_v29  ;;  %v3431_v31 = vunpack.i.l.bf16 %v3430_v29 }
 0xd18   :  { %3439 = vrot.lane.b32.xlu0 %v4101_v28, %s3654_s0 }
 0xd19   :  { %v3303_v32 = vpack.c.bf16 %v3432_v30, %v3431_v31  ;;  %v1557_v33 = vpop.permute.xlu1 %1556 }
 0xd1a   :  { %v4105_v34 = vpack.i.bf16 %v1557_v33, %v1555_v26  ;;  %v1567_v50 = vmul.f32 0.35355338, %v1557_v33 }
 0xd1b   :  { %3305 = vmatprep.subr.msk.bf16.mxu1 %vm3855_vm2, %v3303_v32 }
 0xd1c   :  { %3444 = vrot.lane.b32.xlu1 %v4105_v34, %s3654_s0  ;;  %3308 = vmatpush3.bf16.xpose.msk.msra.mxu1 %vm3855_vm2, %v3303_v32 }
 0xd23   :  { %3123 = vmatmul.mubr.msk.f32.vlgmr.msra.gmra.mrb[16].mxu1 %vm267_vm1, %v1561_v48 }
 0xd24   :  { %3136 = vmatprep.mubr.msk.f32.mxu1 %vm267_vm1, %v1564_v53 }
 0xd83   :  { %v3435_v35 = vpop.permute.xlu1 %3434 }
 0xd84   :  { %v3437_v45 = vunpack.i.h.bf16 %v3435_v35  ;;  %v3436_v39 = vunpack.i.l.bf16 %v3435_v35 }
 0xd86   :  { %v3309_v40 = vpack.c.bf16 %v3437_v45, %v3436_v39 }
 0xd88   :  { %3311 = vmatprep.subr.msk.bf16.mxu0 %vm3855_vm2, %v3309_v40 }
 0xd89   :  { %3314 = vmatpush3.bf16.xpose.msk.msra.mxu0 %vm3855_vm2, %v3309_v40 }
 0xd8a   :  { %v3440_v41 = vpop.permute.xlu0 %3439 }
 0xd8b   :  { %v3442_v42 = vunpack.i.h.bf16 %v3440_v41  ;;  %v3441_v43 = vunpack.i.l.bf16 %v3440_v41 }
 0xd8d   :  { %v3315_v44 = vpack.c.bf16 %v3442_v42, %v3441_v43 }
 0xd8e   :  { %v3445_v60 = vpop.permute.xlu1 %3444 }
 0xd8f   :  { %v3447_v3 = vunpack.i.h.bf16 %v3445_v60  ;;  %v3446_v37 = vunpack.i.l.bf16 %v3445_v60  ;;  %3317 = vmatprep.subr.msk.bf16.mxu1 %vm3855_vm2, %v3315_v44 }
 0xd90   :  { %3130 = vmatmul.mubr.msk.f32.vlgmr.msra.gmra.mrb[10].mxu0 %vm267_vm1, %v1563_v4  ;;  %3320 = vmatpush3.bf16.xpose.msk.msra.mxu1 %vm3855_vm2, %v3315_v44 }
 0xd91   :  { %v3321_v47 = vpack.c.bf16 %v3447_v3, %v3446_v37  ;;  %3143 = vmatprep.mubr.msk.f32.mxu0 %vm267_vm1, %v1566_v46 }
 0xd93   :  { %3323 = vmatprep.subr.msk.bf16.mxu0 %vm3855_vm2, %v3321_v47 }
 0xd94   :  { %3326 = vmatpush3.bf16.xpose.msk.msra.mxu0 %vm3855_vm2, %v3321_v47 }
 0xd97   :  { %3137 = vmatmul.mubr.msk.f32.vlgmr.msra.gmra.mrb[18].mxu1 %vm267_vm1, %v1565_v49 }
 0xd9b   :  { %3144 = vmatmul.mubr.msk.f32.vlgmr.msra.gmra.mrb[12].mxu0 %vm267_vm1, %v1567_v50 }
 0xdf6   :  { %v3124_v52 = vpop.f32.mrb[16].mxu1 }
 0xdf7   :  { %v1654_v54 = vadd.f32 %v3124_v52, %v3885_v17  ;;  %v1648_v55 = vpop.f32.mrb[17].mxu1 }
 0xdf8   :  { %v1649_v56 = vadd.f32 %v1648_v55, %v3887_v18 }
 0xdf9   :  { %v1927_v58 = vsel %vm620_vm3, %v1654_v54, -inf }
 0xdfa   :  { %1928 = vmax.xlane.f32.xlu1 %v1927_v58  ;;  %v1924_v59 = vsel %vm620_vm3, %v1649_v56, -inf }
 0xdfb   :  { %1925 = vmax.xlane.f32.xlu0 %v1924_v59 }
 0xe63   :  { %v3131_v57 = vpop.f32.mrb[10].mxu0 }
 0xe64   :  { %v1743_v61 = vadd.f32 %v3131_v57, %v3885_v17  ;;  %v1737_v62 = vpop.f32.mrb[11].mxu0 }
 0xe65   :  { %v1738_v63 = vadd.f32 %v1737_v62, %v3887_v18 }
 0xe66   :  { %v1933_v0 = vsel %vm620_vm3, %v1743_v61, -inf }
 0xe67   :  { %1934 = vmax.xlane.f32.xlu0 %v1933_v0  ;;  %v1930_v51 = vsel %vm620_vm3, %v1738_v63, -inf }
 0xe6a   :  { %v3138_v1 = vpop.f32.mrb[18].mxu1 }
 0xe6b   :  { %v1832_v2 = vadd.f32 %v3138_v1, %v3885_v17  ;;  %v1826_v5 = vpop.f32.mrb[19].mxu1  ;;  %1931 = vmax.xlane.f32.xlu0 %v1930_v51 }
 0xe6c   :  { %v1827_v6 = vadd.f32 %v1826_v5, %v3887_v18 }
 0xe6d   :  { %v1939_v7 = vsel %vm620_vm3, %v1832_v2, -inf }
 0xe6e   :  { %v3145_v8 = vpop.f32.mrb[12].mxu0  ;;  %1940 = vmax.xlane.f32.xlu1 %v1939_v7  ;;  %v1936_v9 = vsel %vm620_vm3, %v1827_v6, -inf }
 0xe6f   :  { %v1921_v10 = vadd.f32 %v3145_v8, %v3885_v17  ;;  %v1915_v11 = vpop.f32.mrb[13].mxu0  ;;  %1937 = vmax.xlane.f32.xlu0 %v1936_v9 }
 0xe70   :  { %v1916_v12 = vadd.f32 %v1915_v11, %v3887_v18 }
 0xe71   :  { %v1945_v13 = vsel %vm620_vm3, %v1921_v10, -inf }
 0xe72   :  { %1946 = vmax.xlane.f32.xlu1 %v1945_v13  ;;  %v1942_v14 = vsel %vm620_vm3, %v1916_v12, -inf }
 0xe73   :  { %1943 = vmax.xlane.f32.xlu0 %v1942_v14 }
 0xe87   :  { %v1929_v15 = vpop.xlane.xlu1 %1928 }
 0xe88   :  { %v1949_v16 = vsub.f32 %v1654_v54, %v1929_v15  ;;  %v1926_v19 = vpop.xlane.xlu0 %1925 }
 0xe89   :  { %v1948_v21 = vsub.f32 %v1649_v56, %v1926_v19 }
 0xe8a   :  { %v1958_v22 = vmul.f32 1.442695, %v1949_v16 }
 0xe8b   :  { %v1956_v23 = vmul.f32 1.442695, %v1948_v21 }
 0xe8c   :  { %3512 = vpow2.f32 %v1958_v22 }
 0xe8d   :  { %3514 = vpow2.f32 %v1956_v23 }
 0xe96   :  { %v4147_v25 = vpop.eup %3512 }
 0xe97   :  { %v3515_v17 = vpop.eup %3514  ;;  %v1975_v18 = vsel %vm620_vm3, %v4147_v25, 0.0 }
 0xe98   :  { %1976 = vadd.xlane.f32.xlu1 %v1975_v18  ;;  %v1972_v26 = vsel %vm620_vm3, %v3515_v17, 0.0 }
 0xe99   :  { %1973 = vadd.xlane.f32.xlu0 %v1972_v26 }
 0xef4   :  { %v1935_v27 = vpop.xlane.xlu0 %1934 }
 0xef5   :  { %v1951_v29 = vsub.f32 %v1743_v61, %v1935_v27 }
 0xef7   :  { %v1962_v30 = vmul.f32 1.442695, %v1951_v29 }
 0xef8   :  { %v1932_v31 = vpop.xlane.xlu0 %1931 }
 0xef9   :  { %3516 = vpow2.f32 %v1962_v30  ;;  %v1950_v32 = vsub.f32 %v1738_v63, %v1932_v31 }
 0xefb   :  { %v1960_v33 = vmul.f32 1.442695, %v1950_v32  ;;  %v1941_v48 = vpop.xlane.xlu1 %1940 }
 0xefc   :  { %v1953_v53 = vsub.f32 %v1832_v2, %v1941_v48  ;;  %v1938_v35 = vpop.xlane.xlu0 %1937 }
 0xefd   :  { %3518 = vpow2.f32 %v1960_v33  ;;  %v1952_v45 = vsub.f32 %v1827_v6, %v1938_v35  ;;  %v2850_v35 = vld [vmem:[%s4324_s5 + $0x20] sm:$0xff] }
 0xefe   :  { %v1966_v39 = vmul.f32 1.442695, %v1953_v53 }
 0xeff   :  { %v1964_v40 = vmul.f32 1.442695, %v1952_v45  ;;  %v1947_v41 = vpop.xlane.xlu1 %1946  ;;  %v2851_v45 = vld [vmem:[%s4324_s5 + $0x28] sm:$0xff] }
 0xf00   :  { %3520 = vpow2.f32 %v1966_v39  ;;  %v1955_v42 = vsub.f32 %v1921_v10, %v1947_v41  ;;  %v1944_v43 = vpop.xlane.xlu0 %1943  ;;  %v3343_v39 = vpack.c.bf16 %v2851_v45, %v2850_v35  ;;  %v2853_v41 = vld [vmem:[%s4324_s5 + $0x38] sm:$0xff] }
 0xf01   :  { %3522 = vpow2.f32 %v1964_v40  ;;  %v1954_v44 = vsub.f32 %v1916_v12, %v1944_v43  ;;  %v2852_v40 = vld [vmem:[%s4324_s5 + $0x30] sm:$0xff]  ;;  %s4350_s5 = smov 24  }
 0xf02   :  { %v1970_v4 = vmul.f32 1.442695, %v1955_v42  ;;  %v3347_v42 = vpack.c.bf16 %v2853_v41, %v2852_v40  ;;  %v2857_v40 = vld [vmem:[%s4332_s13 + $0x1] ss:$0 sm:$0xff] }
 0xf03   :  { %v4152_v60 = vpop.eup %3516  ;;  %v1968_v46 = vmul.f32 1.442695, %v1954_v44 }
 0xf04   :  { %3524 = vpow2.f32 %v1970_v4  ;;  %v1981_v3 = vsel %vm620_vm3, %v4152_v60, 0.0 }
 0xf05   :  { %3526 = vpow2.f32 %v1968_v46  ;;  %1982 = vadd.xlane.f32.xlu1 %v1981_v3 }
 0xf07   :  { %v4156_v37 = vpop.eup %3518 }
 0xf08   :  { %v1978_v47 = vsel %vm620_vm3, %v4156_v37, 0.0 }
 0xf09   :  { %1979 = vadd.xlane.f32.xlu0 %v1978_v47 }
 0xf0a   :  { %v4160_v49 = vpop.eup %3520 }
 0xf0b   :  { %v3523_v50 = vpop.eup %3522  ;;  %v1987_v52 = vsel %vm620_vm3, %v4160_v49, 0.0 }
 0xf0c   :  { %1988 = vadd.xlane.f32.xlu1 %v1987_v52  ;;  %v1984_v54 = vsel %vm620_vm3, %v3523_v50, 0.0 }
 0xf0d   :  { %1985 = vadd.xlane.f32.xlu0 %v1984_v54 }
 0xf0e   :  { %v4165_v55 = vpop.eup %3524 }
 0xf0f   :  { %v4167_v56 = vpop.eup %3526  ;;  %v1993_v58 = vsel %vm620_vm3, %v4165_v55, 0.0 }
 0xf10   :  { %1994 = vadd.xlane.f32.xlu1 %v1993_v58  ;;  %v1990_v59 = vsel %vm620_vm3, %v4167_v56, 0.0 }
 0xf11   :  { %1991 = vadd.xlane.f32.xlu0 %v1990_v59 }
 0xf21   :  { %3454 = vrot.lane.b32.xlu1 %v4096_v24, %s3655_s24 }
 0xf25   :  { %3459 = vrot.lane.b32.xlu1 %v4101_v28, %s3655_s24  ;;  %v1977_v63 = vpop.xlane.xlu1 %1976 }
 0xf26   :  { %v1974_v57 = vpop.xlane.xlu0 %1973 }
 0xf27   :  { %3528 = vrcp.f32 %v1974_v57  ;;  %3449 = vrot.lane.b32.xlu0 %v4087_v20, %s3655_s24 }
 0xf29   :  { %3464 = vrot.lane.b32.xlu1 %v4105_v34, %s3655_s24 }
 0xf31   :  { %v3529_v61 = vpop.eup %3528 }
 0xf32   :  { %v1997_v62 = vmul.f32 %v3529_v61, %v3515_v17 }
 0xf34   :  { %3150 = vmatprep.mubr.msk.f32.mxu1 %vm620_vm3, %v1997_v62 }
 0xf92   :  { %v1983_v0 = vpop.xlane.xlu1 %1982 }
 0xf96   :  { %v1980_v1 = vpop.xlane.xlu0 %1979 }
 0xf99   :  { %v1989_v51 = vpop.xlane.xlu1 %1988 }
 0xf9a   :  { %v1986_v24 = vpop.xlane.xlu0 %1985 }
 0xf9b   :  { %3530 = vrcp.f32 %v1986_v24 }
 0xf9c   :  { %3532 = vrcp.f32 %v1977_v63 }
 0xf9d   :  { %3534 = vrcp.f32 %v1980_v1  ;;  %v1995_v28 = vpop.xlane.xlu1 %1994 }
 0xf9e   :  { %v1992_v2 = vpop.xlane.xlu0 %1991  ;;  %3536 = vrcp.f32 %v1989_v51 }
 0xf9f   :  { %3538 = vrcp.f32 %v1983_v0  ;;  %v2854_v0 = vld [vmem:[%s4325_s6 + $0x1] ss:$0 sm:$0xff] }
 0xfa0   :  { %3540 = vrcp.f32 %v1992_v2 }
 0xfa1   :  { %v3455_v20 = vpop.permute.xlu1 %3454  ;;  %3542 = vrcp.f32 %v1995_v28 }
 0xfa2   :  { %v3450_v5 = vpop.permute.xlu0 %3449  ;;  %v3457_v34 = vunpack.i.h.bf16 %v3455_v20  ;;  %v3456_v6 = vunpack.i.l.bf16 %v3455_v20 }
 0xfa3   :  { %v3452_v7 = vunpack.i.h.bf16 %v3450_v5  ;;  %v3451_v8 = vunpack.i.l.bf16 %v3450_v5 }
 0xfa4   :  { %v3331_v19 = vpack.c.bf16 %v3457_v34, %v3456_v6 }
 0xfa5   :  { %v3531_v9 = vpop.eup %3530  ;;  %v3327_v10 = vpack.c.bf16 %v3452_v7, %v3451_v8  ;;  %v3460_v11 = vpop.permute.xlu1 %3459 }
 0xfa6   :  { %v3533_v12 = vpop.eup %3532  ;;  %v3462_v13 = vunpack.i.h.bf16 %v3460_v11  ;;  %v3461_v14 = vunpack.i.l.bf16 %v3460_v11  ;;  %v2005_v15 = vmul.f32 %v3531_v9, %v3523_v50 }
 0xfa7   :  { %v3535_v16 = vpop.eup %3534  ;;  %3328 = vmatprep.subr.bf16.mxu1 %v3327_v10  ;;  %v1999_v23 = vmul.f32 %v3533_v12, %v4147_v25 }
 0xfa8   :  { %v3335_v21 = vpack.c.bf16 %v3462_v13, %v3461_v14  ;;  %3330 = vmatpush3.bf16.msra.mxu1 %v3327_v10  ;;  %3164 = vmatprep.mubr.msk.f32.mxu0 %vm620_vm3, %v2005_v15  ;;  %v3537_v22 = vpop.eup %3536  ;;  %v2001_v29 = vmul.f32 %v3535_v16, %v4156_v37  ;;  %v2859_v14 = vld [vmem:[%s4326_s7 + $0x20] sm:$0xff]  ;;  %v2860_v15 = vld [vmem:[%s4326_s7 + $0x28] sm:$0xff] }
 0xfa9   :  { %v3465_v17 = vpop.permute.xlu1 %3464  ;;  %3332 = vmatprep.subr.bf16.mxu1 %v3331_v19  ;;  %v3539_v18 = vpop.eup %3538  ;;  %v2007_v31 = vmul.f32 %v3537_v22, %v4160_v49  ;;  %v3351_v16 = vpack.c.bf16 %v2860_v15, %v2859_v14 }
 0xfaa   :  { %v3467_v26 = vunpack.i.h.bf16 %v3465_v17  ;;  %v3466_v27 = vunpack.i.l.bf16 %v3465_v17  ;;  %3336 = vmatprep.subr.bf16.mxu0 %v3335_v21  ;;  %v3541_v30 = vpop.eup %3540  ;;  %v2003_v25 = vmul.f32 %v3539_v18, %v4152_v60  ;;  %v2867_v17 = vld [vmem:[%s4328_s9 + $0x48] sm:$0xff]  ;;  %v2868_v18 = vld [vmem:[%s4328_s9 + $0x50] sm:$0xff] }
 0xfab   :  { %3151 = vmatmul.mubr.msk.f32.vlgmr.msra.gmra.mrb[20].mxu1 %vm620_vm3, %v1999_v23  ;;  %3338 = vmatpush3.bf16.msra.mxu0 %v3335_v21  ;;  %v3543_v33 = vpop.eup %3542  ;;  %v2009_v48 = vmul.f32 %v3541_v30, %v4167_v56  ;;  %v2862_v21 = vld [vmem:[%s4326_s7 + $0x38] sm:$0xff]  ;;  %v2866_v23 = vld [vmem:[%s4328_s9 + $0x40] sm:$0xff] }
 0xfac   :  { %v3339_v32 = vpack.c.bf16 %v3467_v26, %v3466_v27  ;;  %3334 = vmatpush3.bf16.msra.mxu1 %v3331_v19  ;;  %3157 = vmatprep.mubr.msk.f32.mxu1 %vm620_vm3, %v2001_v29  ;;  %v2011_v53 = vmul.f32 %v3543_v33, %v4165_v55  ;;  %v2861_v19 = vld [vmem:[%s4326_s7 + $0x30] sm:$0xff]  ;;  %v3359_v26 = vpack.c.bf16 %v2867_v17, %v2866_v23  ;;  %v2869_v27 = vld [vmem:[%s4328_s9 + $0x58] sm:$0xff]  ;;  %v2870_v30 = vld [vmem:[%s4328_s9 + $0x60] sm:$0xff] }
 0xfad   :  { %3344 = vmatprep.subr.bf16.mxu0 %v3343_v39  ;;  %v3355_v22 = vpack.c.bf16 %v2862_v21, %v2861_v19  ;;  %v3363_v29 = vpack.c.bf16 %v2869_v27, %v2868_v18  ;;  %v2877_v19 = vld [vmem:[%s4334_s15] ss:$0 sm:$0xff] }
 0xfae   :  { %3165 = vmatmul.mubr.msk.f32.vlgmr.msra.gmra.mrb[14].mxu0 %vm620_vm3, %v2007_v31  ;;  %3340 = vmatprep.subr.bf16.mxu1 %v3339_v32  ;;  %v2871_v31 = vld [vmem:[%s4328_s9 + $0x68] sm:$0xff]  ;;  %v2878_v17 = vld [vmem:[%s4335_s16] ss:$0 sm:$0xff] }
 0xfaf   :  { %3158 = vmatmul.mubr.msk.f32.vlgmr.msra.gmra.mrb[22].mxu1 %vm620_vm3, %v2003_v25  ;;  %3346 = vmatpush3.bf16.msra.mxu0 %v3343_v39 }
 0xfb0   :  { %3342 = vmatpush3.bf16.msra.mxu1 %v3339_v32  ;;  %3171 = vmatprep.mubr.msk.f32.mxu1 %vm620_vm3, %v2009_v48  ;;  %v3367_v32 = vpack.c.bf16 %v2871_v31, %v2870_v30 }
 0xfb1   :  { %3348 = vmatprep.subr.bf16.mxu0 %v3347_v42  ;;  %3352 = vmatprep.subr.bf16.mxu1 %v3351_v16 }
 0xfb3   :  { %3172 = vmatmul.mubr.msk.f32.vlgmr.msra.gmra.mrb[24].mxu1 %vm620_vm3, %v2011_v53  ;;  %3350 = vmatpush3.bf16.msra.mxu0 %v3347_v42  ;;  %v2858_v42 = vld [vmem:[%s4333_s14 + $0x1] ss:$0 sm:$0xff] }
 0xfb4   :  { %3354 = vmatpush3.bf16.msra.mxu1 %v3351_v16  ;;  %3360 = vmatprep.subr.bf16.mxu0 %v3359_v26 }
 0xfb5   :  { %3356 = vmatprep.subr.bf16.mxu1 %v3355_v22 }
 0xfb8   :  { %3358 = vmatpush3.bf16.msra.mxu1 %v3355_v22 }
0x107e   :  { %v3152_v43 = vpop.f32.mrb[20].mxu1 }
0x107f   :  { %v2090_v44 = vpop.f32.mrb[21].mxu1 }
0x1081   :  { %v3166_v4 = vpop.f32.mrb[14].mxu0 }
0x1082   :  { %v3159_v60 = vpop.f32.mrb[22].mxu1  ;;  %v2264_v46 = vpop.f32.mrb[15].mxu0 }
0x1083   :  { %2364 = vrot.lane.b32.xlu1 %v3159_v60, %s3649_s23  ;;  %v2177_v3 = vpop.f32.mrb[23].mxu1 }
0x1084   :  { %2362 = vrot.lane.b32.xlu0 %v2177_v3, %s3649_s23 }
0x1086   :  { %v3173_v37 = vpop.f32.mrb[24].mxu1 }
0x1087   :  { %2372 = vrot.lane.b32.xlu1 %v3166_v4, %s3656_s21  ;;  %v2351_v47 = vpop.f32.mrb[25].mxu1 }
0x1088   :  { %2370 = vrot.lane.b32.xlu0 %v2264_v46, %s3656_s21 }
0x108b   :  { %2380 = vrot.lane.b32.xlu1 %v3173_v37, %s4350_s5  ;;  %v2872_v37 = vld [vmem:[%s4328_s9 + $0x70] sm:$0xff] }
0x108c   :  { %2378 = vrot.lane.b32.xlu0 %v2351_v47, %s4350_s5  ;;  %v2873_v47 = vld [vmem:[%s4328_s9 + $0x78] sm:$0xff] }
0x10f5   :  { %v2365_v49 = vpop.permute.xlu1 %2364 }
0x10f6   :  { %v2363_v50 = vpop.permute.xlu0 %2362  ;;  %v2385_v58 = vsel %vm267_vm1, %v3152_v43, %v2365_v49  ;;  %v3371_v49 = vpack.c.bf16 %v2873_v47, %v2872_v37 }
0x10f7   :  { %v2384_v55 = vsel %vm267_vm1, %v2090_v44, %v2363_v50  ;;  %v2863_v50 = vld [vmem:[%s4327_s8 + $0x1] ss:$0 sm:$0xff] }
0x10f9   :  { %v2373_v52 = vpop.permute.xlu1 %2372 }
0x10fa   :  { %v2371_v54 = vpop.permute.xlu0 %2370  ;;  %v2387_v61 = vsel %vm620_vm3, %v2385_v58, %v2373_v52 }
0x10fb   :  { %v2386_v59 = vsel %vm620_vm3, %v2384_v55, %v2371_v54 }
0x10fd   :  { %v2381_v56 = vpop.permute.xlu1 %2380 }
0x10fe   :  { %v2379_v57 = vpop.permute.xlu0 %2378  ;;  %v2389_v63 = vsel %vm1085_vm4, %v2387_v61, %v2381_v56 }
0x10ff   :  { %v2388_v62 = vsel %vm1085_vm4, %v2386_v59, %v2379_v57  ;;  %v2874_v57 = vld [vmem:[%s4329_s10 + $0x1] ss:$0 sm:$0xff] }
0x1100   :  { %3182 = vmatprep.mubr.msk.f32.mxu0 %vm105_vm0, %v2388_v62 }
0x1101   :  { %3183 = vmatmul.mubr.msk.f32.vlgmr.msra.gmra.mrb[16].mxu0 %vm105_vm0, %v2389_v63 }
0x1102   :  { %3362 = vmatpush3.bf16.msra.mxu0 %v3359_v26 }
0x1103   :  { %3364 = vmatprep.subr.bf16.mxu0 %v3363_v29 }
0x1106   :  { %3366 = vmatpush3.bf16.msra.mxu0 %v3363_v29 }
0x1107   :  { %3368 = vmatprep.subr.bf16.mxu0 %v3367_v32 }
0x110a   :  { %3370 = vmatpush3.bf16.msra.mxu0 %v3367_v32 }
0x110b   :  { %3372 = vmatprep.subr.bf16.mxu0 %v3371_v49 }
0x110e   :  { %3374 = vmatpush3.bf16.msra.mxu0 %v3371_v49 }
0x11d4   :  { %v3184_v1 = vpop.f32.mrb[16].mxu0 }
0x11d5   :  { %v2478_v51 = vadd.f32 %v3184_v1, %v2854_v0  ;;  %v2472_v24 = vpop.f32.mrb[17].mxu0 }
0x11d6   :  { %v2473_v28 = vadd.f32 %v2854_v0, %v2472_v24 }
0x11d7   :  { %v4225_v2 = vadd.f32 %v2478_v51, %v4049_v36 }
0x11d8   :  { %v4228_v20 = vadd.f32 %v2473_v28, %v4052_v38 }
0x11d9   :  { %v2488_v5 = vsel %vm105_vm0, %v4225_v2, 0.0 }
0x11da   :  { %2489 = vadd.xlane.f32.xlu1 %v2488_v5  ;;  %v2485_v34 = vsel %vm105_vm0, %v4228_v20, 0.0 }
0x11db   :  { %2486 = vadd.xlane.f32.xlu0 %v2485_v34 }
0x1267   :  { %v2490_v6 = vpop.xlane.xlu1 %2489 }
0x1268   :  { %v2492_v7 = vmul.f32 0.03125, %v2490_v6  ;;  %v2487_v8 = vpop.xlane.xlu0 %2486 }
0x1269   :  { %v2491_v9 = vmul.f32 0.03125, %v2487_v8 }
0x126a   :  { %v2494_v10 = vsub.f32 %v4225_v2, %v2492_v7 }
0x126b   :  { %v2493_v36 = vsub.f32 %v4228_v20, %v2491_v9 }
0x126c   :  { %v2496_v12 = vmul.f32 %v2494_v10, %v2494_v10 }
0x126d   :  { %v2495_v11 = vmul.f32 %v2493_v36, %v2493_v36 }
0x126e   :  { %v2500_v13 = vsel %vm105_vm0, %v2496_v12, 0.0 }
0x126f   :  { %v2497_v38 = vsel %vm105_vm0, %v2495_v11, 0.0 }
0x1270   :  { %2498 = vadd.xlane.f32.xlu0 %v2497_v38 }
0x1274   :  { %2501 = vadd.xlane.f32.xlu0 %v2500_v13 }
0x12fd   :  { %v2499_v25 = vpop.xlane.xlu0 %2498 }
0x12fe   :  { %v2503_v33 = vmul.f32 0.03125, %v2499_v25 }
0x1300   :  { %v2505_v48 = vadd.f32 1e-05, %v2503_v33 }
0x1301   :  { %v2502_v53 = vpop.xlane.xlu0 %2501 }
0x1302   :  { %3544 = vrsqrt.f32 %v2505_v48  ;;  %v2504_v35 = vmul.f32 0.03125, %v2502_v53 }
0x1304   :  { %v2506_v45 = vadd.f32 1e-05, %v2504_v35 }
0x1306   :  { %3546 = vrsqrt.f32 %v2506_v45 }
0x130c   :  { %v3545_v39 = vpop.eup %3544 }
0x130d   :  { %v2509_v41 = vmul.f32 %v3545_v39, %v2493_v36 }
0x130f   :  { %v2515_v43 = vmul.f32 %v2857_v40, %v2509_v41 }
0x1310   :  { %v3547_v44 = vpop.eup %3546 }
0x1311   :  { %v2510_v4 = vmul.f32 %v3547_v44, %v2494_v10  ;;  %v2521_v60 = vadd.f32 %v2858_v42, %v2515_v43 }
0x1313   :  { %v2516_v46 = vmul.f32 %v2857_v40, %v2510_v4  ;;  %3193 = vmatprep.mubr.msk.f32.mxu1 %vm105_vm0, %v2521_v60 }
0x1315   :  { %v2522_v3 = vadd.f32 %v2858_v42, %v2516_v46 }
0x1317   :  { %3194 = vmatmul.mubr.msk.f32.vlgmr.msra.gmra.mrb[26].mxu1 %vm105_vm0, %v2522_v3 }
0x13ea   :  { %v3195_v52 = vpop.f32.mrb[26].mxu1 }
0x13eb   :  { %v2611_v54 = vadd.f32 %v3195_v52, %v2863_v50  ;;  %v2605_v55 = vpop.f32.mrb[27].mxu1 }
0x13ec   :  { %v2606_v56 = vadd.f32 %v2863_v50, %v2605_v55 }
0x13ed   :  { %v2615_v59 = vmax.f32 %v2611_v54, 0.0 }
0x13ee   :  { %v2614_v58 = vmax.f32 %v2606_v56, 0.0 }
0x13f0   :  { %3212 = vmatprep.mubr.msk.f32.mxu0 %vm1325_vm5, %v2614_v58 }
0x13f1   :  { %3213 = vmatmul.mubr.msk.f32.vlgmr.msra.gmra.mrb[18].mxu0 %vm1325_vm5, %v2615_v59 }
0x14c4   :  { %v3214_v61 = vpop.f32.mrb[18].mxu0 }
0x14c5   :  { %v2708_v62 = vadd.f32 %v3214_v61, %v2874_v57  ;;  %v2702_v63 = vpop.f32.mrb[19].mxu0 }
0x14c6   :  { %v2703_v0 = vadd.f32 %v2874_v57, %v2702_v63 }
0x14c7   :  { %v2712_v1 = vadd.f32 %v2708_v62, %v4225_v2 }
0x14c8   :  { %v2711_v51 = vadd.f32 %v2703_v0, %v4228_v20 }
0x14c9   :  { %v2718_v24 = vsel %vm105_vm0, %v2712_v1, 0.0 }
0x14ca   :  { %2719 = vadd.xlane.f32.xlu1 %v2718_v24  ;;  %v2715_v28 = vsel %vm105_vm0, %v2711_v51, 0.0 }
0x14cb   :  { %2716 = vadd.xlane.f32.xlu0 %v2715_v28 }
0x1557   :  { %v2720_v5 = vpop.xlane.xlu1 %2719 }
0x1558   :  { %v2722_v34 = vmul.f32 0.03125, %v2720_v5  ;;  %v2717_v6 = vpop.xlane.xlu0 %2716 }
0x1559   :  { %v2721_v7 = vmul.f32 0.03125, %v2717_v6 }
0x155a   :  { %v2724_v8 = vsub.f32 %v2712_v1, %v2722_v34 }
0x155b   :  { %v2723_v9 = vsub.f32 %v2711_v51, %v2721_v7 }
0x155c   :  { %v2726_v10 = vmul.f32 %v2724_v8, %v2724_v8 }
0x155d   :  { %v2725_v36 = vmul.f32 %v2723_v9, %v2723_v9 }
0x155e   :  { %v2730_v11 = vsel %vm105_vm0, %v2726_v10, 0.0 }
0x155f   :  { %2731 = vadd.xlane.f32.xlu1 %v2730_v11  ;;  %v2727_v2 = vsel %vm105_vm0, %v2725_v36, 0.0 }
0x1560   :  { %2728 = vadd.xlane.f32.xlu0 %v2727_v2 }
0x15ec   :  { %v2732_v20 = vpop.xlane.xlu1 %2731 }
0x15ed   :  { %v2734_v38 = vmul.f32 0.03125, %v2732_v20  ;;  %v2729_v12 = vpop.xlane.xlu0 %2728 }
0x15ee   :  { %v2733_v13 = vmul.f32 0.03125, %v2729_v12 }
0x15ef   :  { %v2736_v14 = vadd.f32 1e-05, %v2734_v38 }
0x15f0   :  { %v2735_v15 = vadd.f32 1e-05, %v2733_v13 }
0x15f1   :  { %3548 = vrsqrt.f32 %v2736_v14 }
0x15f2   :  { %3550 = vrsqrt.f32 %v2735_v15 }
0x15fb   :  { %v3549_v16 = vpop.eup %3548 }
0x15fc   :  { %v3551_v21 = vpop.eup %3550  ;;  %v2740_v22 = vmul.f32 %v3549_v16, %v2724_v8 }
0x15fd   :  { %v2739_v23 = vmul.f32 %v3551_v21, %v2723_v9 }
0x15fe   :  { %v2748_v18 = vmul.f32 %v2877_v19, %v2740_v22 }
0x15ff   :  { %v2747_v26 = vmul.f32 %v2877_v19, %v2739_v23 }
0x1600   :  { %v2756_v27 = vadd.f32 %v2878_v17, %v2748_v18 }
0x1601   :  { %v2755_v29 = vadd.f32 %v2878_v17, %v2747_v26 }
0x1602   :  { %2758 = vst.msk [vmem:[#allocation8 + $0x8] sm:$0xff] %vm105_vm0, %v2756_v27 }
0x1603   :  { %2757 = vst.msk [vmem:[#allocation8] sm:$0xff] %vm105_vm0, %v2755_v29 }
0x1604   :  { %3629 = shalt.err (!%p3626_p0)
}
0x1605   :  { %s4351_s4 = sld [smem:[#allocation14_spill]] }
0x160b   :  { %s3630_s11 = scalar_lea.hbm %s4351_s4, 256 }
0x160c   :  { %p3631_p1 = scmp.ne.s32.totalorder %s4351_s4, %s3630_s11  ;;  %p3634_p2 = scmp.lt.u32.totalorder %s3630_s11, %s4351_s4 }
0x160e   :  { %p3636_p3 = pnand %p3634_p2, %p3631_p1 }
0x1610   :  { %3639 = shalt.err (!%p3636_p3)
}
0x1611   :  { %s4352_s25 = smov 128  }
0x1612   :  { %2770 = dma.vmem_to_hbm [thread:$0]  %s2765_s17, 256, %s4351_s4, [#allocation4], %s4352_s25, %s4352_s25, %s3649_s23  }
0x1613   :  { %3644 = dma.done.wait [#allocation4], 256  }
0x1614   :  { %3645 = vsyncadd [#allocation4], 4294967040 }
0x1615   :  { %2774 = vsyncpa [#allocation3], 1 }
0x1616   :  { %2775 = vsyncpa [#allocation6], 1 }
0x1617   :  { %2776 = vsyncpa [#allocation4], 1 }

</bundles_post_ra>
